<compile_context>
chip_gen: v7x
topology: tpu7x:2x2x1
jax: 0.10.0
libtpu: 0.0.40
codegen_flags: <defaults>
</compile_context>

<pallas_src>
import numpy as np
import jax
import jax.numpy as jnp
from jax.experimental import pallas as pl
from jax.experimental.pallas import tpu as pltpu

# ---- configuration (small, MXU / lane aligned) -------------------------------
FIELD_DIMS = (10, 20, 30, 40)            # field_dims
NUM_FIELDS = len(FIELD_DIMS)             # F = 4
EMB_DIM = 16                             # embedding_dim
# TODO(synk): 128-wide stand-in for the reference (400,400,400); at the real
# config pad hidden dims to 256 multiples for the v6e/v7x 256x256 MXU.
HIDDEN = (128, 128, 128)
BATCH = 256
TB = 256                                 # batch tile == padded batch -> grid of 1
PACK = 128                               # packed gather-output width (lanes)
TOTAL = sum(FIELD_DIMS)                  # 100 embedding rows
TOTAL_PAD = 128                          # vocab rows padded to MXU K
BN_EPS = 1e-5

OFFSETS = tuple(int(v) for v in (0, *np.cumsum(FIELD_DIMS)[:-1]))

DEEP_IN = NUM_FIELDS * EMB_DIM           # 64 : flattened deep embeddings
_S0 = DEEP_IN                            # 64 : sum_f emb        (E lanes)
_S1 = _S0 + EMB_DIM                      # 80 : sum_f emb^2      (E lanes)
_S2 = _S1 + EMB_DIM                      # 96 : first-order sum  (1 lane)
_BIAS_LANE = _S2 + 1                     # 97 : constant-1 bias carrier
assert _BIAS_LANE + 1 <= PACK and TOTAL <= TOTAL_PAD and TB % 8 == 0


# ---- Pallas kernel: gather + FM + 3-layer MLP + output projection ------------
def deepfm_kernel(idx_ref, table_ref, w1_ref, w2_ref, w3_ref, misc_ref, out_ref):
    tb = idx_ref.shape[0]

    # -- fused embedding gather: multi-hot over the concatenated vocabulary ----
    idx = idx_ref[...]                                           # (TB, F) int32
    col = jax.lax.broadcasted_iota(jnp.int32, (tb, TOTAL_PAD), 1)
    multihot = jnp.zeros((tb, TOTAL_PAD), jnp.float32)
    for f in range(NUM_FIELDS):                                  # F=4, unrolled
        row = idx[:, f:f + 1] + OFFSETS[f]                       # offsets baked in
        multihot = multihot + (col == row).astype(jnp.float32)

    # One exact MXU gather: feat = multihot @ table  (f32), lane layout:
    #   [0:64)  flattened deep embeddings (one 16-wide block per field)
    #   [64:80) s  = sum_f fm_emb          [80:96) sq = sum_f fm_emb^2
    #   96      fo = first-order sum       97      1.0 (bias carrier)
    feat = jnp.dot(multihot, table_ref[...],
                   preferred_element_type=jnp.float32)           # (TB, PACK) f32

    # -- deep tower: (Linear w/ folded BN -> ReLU) x3, bf16 MXU / f32 acc ------
    # W1 rows >= DEEP_IN are zero, so the FM lanes of `feat` contribute nothing.
    h = jnp.dot(feat.astype(jnp.bfloat16), w1_ref[...],
                preferred_element_type=jnp.float32) + misc_ref[0:1, :]
    h = jnp.maximum(h, 0.0)
    h = jnp.dot(h.astype(jnp.bfloat16), w2_ref[...],
                preferred_element_type=jnp.float32) + misc_ref[1:2, :]
    h = jnp.maximum(h, 0.0)
    h = jnp.dot(h.astype(jnp.bfloat16), w3_ref[...],
                preferred_element_type=jnp.float32) + misc_ref[2:3, :]
    h = jnp.maximum(h, 0.0)                                      # (TB, H3) f32

    # -- FM slab: square the s lanes, pass everything else through (f32) -------
    fm_slab = jnp.where((col >= _S0) & (col < _S1), feat * feat, feat)

    # -- final projection, lane-dense (1, TB) output ----------------------------
    #   misc row 3 = deep output weights w_out[1:, 0]
    #   misc row 4 = [+0.5*w_fm on s^2 lanes, -0.5*w_fm on sq lanes,
    #                 w_fm on fo lane, b_out on the bias-carrier lane]
    # Contract the last dims of both operands (A @ B^T) so the result is a row.
    dn = (((1,), (1,)), ((), ()))
    proj_d = jax.lax.dot_general(misc_ref[...], h, dn,
                                 preferred_element_type=jnp.float32)      # (8, TB)
    proj_f = jax.lax.dot_general(misc_ref[...], fm_slab, dn,
                                 preferred_element_type=jnp.float32)      # (8, TB)
    out_ref[...] = proj_d[3:4, :] + proj_f[4:5, :]               # (1, TB) f32


# ---- parameter init (deterministic, xavier-normal-like, matches module) ------
def init_params(key):
    ks = jax.random.split(key, 16)

    def xavier(k, shape):
        fan_in = shape[0]
        fan_out = shape[1] if len(shape) > 1 else 1
        std = float(np.sqrt(2.0 / (fan_in + fan_out)))
        return jax.random.normal(k, shape, jnp.float32) * std

    params = {}
    params["fm_first_order_w"] = xavier(ks[0], (TOTAL, 1))
    params["fm_embedding"] = xavier(ks[1], (TOTAL, EMB_DIM))
    params["feature_embeddings"] = xavier(ks[2], (TOTAL, EMB_DIM))

    dims = [DEEP_IN] + list(HIDDEN)
    for i in range(3):
        params[f"w{i + 1}"] = xavier(ks[3 + i], (dims[i], dims[i + 1]))
        params[f"b{i + 1}"] = xavier(ks[6 + i], (1, dims[i + 1]))
        params[f"g{i + 1}"] = jnp.ones((1, dims[i + 1]), jnp.float32)    # BN gamma
        params[f"be{i + 1}"] = jnp.zeros((1, dims[i + 1]), jnp.float32)  # BN beta
        params[f"m{i + 1}"] = jnp.zeros((1, dims[i + 1]), jnp.float32)   # BN mean
        params[f"v{i + 1}"] = jnp.ones((1, dims[i + 1]), jnp.float32)    # BN var

    # output_layer: Linear(H_last + 1, 1); row 0 multiplies fm_out, rest deep.
    params["w_out"] = xavier(ks[9], (HIDDEN[-1] + 1, 1))
    params["b_out"] = xavier(ks[10], (1, 1))
    return params


# ---- one-time operand preparation (hoisted out of the per-call path) ---------
def prepare_operands(params):
    # Fold eval-mode BatchNorm into the preceding Linear (exact, 1/sqrt per review).
    def fold(i):
        scale = params[f"g{i}"] / jnp.sqrt(params[f"v{i}"] + BN_EPS)
        w = params[f"w{i}"] * scale
        b = (params[f"b{i}"] - params[f"m{i}"]) * scale + params[f"be{i}"]
        return w, b

    w1, b1 = fold(1)
    w2, b2 = fold(2)
    w3, b3 = fold(3)

    # Packed gather table (TOTAL_PAD, PACK): one matmul produces deep embeddings,
    # FM field sums, first-order sum and a constant-1 bias carrier.
    fe = params["feature_embeddings"]
    table = jnp.zeros((TOTAL_PAD, PACK), jnp.float32)
    for f in range(NUM_FIELDS):
        lo = OFFSETS[f]
        hi = lo + FIELD_DIMS[f]
        table = table.at[lo:hi, f * EMB_DIM:(f + 1) * EMB_DIM].set(fe[lo:hi])
    table = table.at[:TOTAL, _S0:_S1].set(params["fm_embedding"])
    table = table.at[:TOTAL, _S1:_S2].set(params["fm_embedding"] ** 2)
    table = table.at[:TOTAL, _S2].set(params["fm_first_order_w"][:, 0])
    # bias carrier: each of the NUM_FIELDS one-hot hits adds 1/NUM_FIELDS -> 1.0
    table = table.at[:TOTAL, _BIAS_LANE].set(1.0 / NUM_FIELDS)

    # W1 zero-padded over the FM / bias-carrier lanes of the packed input.
    w1p = jnp.zeros((PACK, HIDDEN[0]), jnp.float32).at[:DEEP_IN, :].set(w1)

    # Pack biases + output layer into a single (8, PACK) f32 operand.
    w_fm = params["w_out"][0, 0]
    b_out = params["b_out"][0, 0]
    misc = jnp.zeros((8, PACK), jnp.float32)
    misc = misc.at[0, :HIDDEN[0]].set(b1[0])
    misc = misc.at[1, :HIDDEN[1]].set(b2[0])
    misc = misc.at[2, :HIDDEN[2]].set(b3[0])
    misc = misc.at[3, :HIDDEN[2]].set(params["w_out"][1:, 0])
    misc = misc.at[4, _S0:_S1].set(0.5 * w_fm)
    misc = misc.at[4, _S1:_S2].set(-0.5 * w_fm)
    misc = misc.at[4, _S2].set(w_fm)
    misc = misc.at[4, _BIAS_LANE].set(b_out)

    return dict(table=table,
                w1=w1p.astype(jnp.bfloat16),
                w2=w2.astype(jnp.bfloat16),
                w3=w3.astype(jnp.bfloat16),
                misc=misc)


# ---- forward wrapper (per call: only the pallas_call + tiny output reshape) --
@jax.jit
def deepfm_forward(ops, x):
    B = x.shape[0]
    Bp = pl.cdiv(B, TB) * TB
    if Bp != B:
        x = jnp.concatenate([x, jnp.zeros((Bp - B, NUM_FIELDS), x.dtype)], axis=0)

    const = lambda i: (0, 0)
    mm = (TOTAL_PAD * PACK + PACK * HIDDEN[0] + HIDDEN[0] * HIDDEN[1]
          + HIDDEN[1] * HIDDEN[2] + 2 * 8 * PACK)
    cost = pl.CostEstimate(
        flops=2 * Bp * mm,
        transcendentals=0,
        bytes_accessed=(4 * Bp * NUM_FIELDS + 4 * TOTAL_PAD * PACK
                        + 2 * PACK * (HIDDEN[0] + HIDDEN[1] + HIDDEN[2])
                        + 4 * 8 * PACK + 4 * Bp))

    out = pl.pallas_call(
        deepfm_kernel,
        out_shape=jax.ShapeDtypeStruct((Bp // TB, TB), jnp.float32),
        grid=(Bp // TB,),                                   # = 1 grid step here
        in_specs=[
            pl.BlockSpec((TB, NUM_FIELDS), lambda i: (i, 0)),      # field indices i32
            pl.BlockSpec((TOTAL_PAD, PACK), const),                # gather table  f32
            pl.BlockSpec((PACK, HIDDEN[0]), const),                # W1 (padded)   bf16
            pl.BlockSpec((HIDDEN[0], HIDDEN[1]), const),           # W2            bf16
            pl.BlockSpec((HIDDEN[1], HIDDEN[2]), const),           # W3            bf16
            pl.BlockSpec((8, PACK), const),                        # biases/out pack f32
        ],
        out_specs=pl.BlockSpec((1, TB), lambda i: (i, 0)),         # lane-dense row
        compiler_params=pltpu.CompilerParams(
            dimension_semantics=("arbitrary",)),
        cost_estimate=cost,
    )(x, ops["table"], ops["w1"], ops["w2"], ops["w3"], ops["misc"])

    return out.reshape(-1)[:B, None]                               # (B, 1) f32


# ---- pure-JAX reference of the original module (eval mode) -------------------
def reference_forward(params, x):
    off = jnp.asarray(OFFSETS, jnp.int32)
    x_off = x + off[None, :]
    fo = jnp.sum(params["fm_first_order_w"][:, 0][x_off], axis=1, keepdims=True)
    emb = params["fm_embedding"][x_off]                            # (B, F, E)
    second = 0.5 * jnp.sum(jnp.sum(emb, axis=1) ** 2 - jnp.sum(emb ** 2, axis=1),
                           axis=1, keepdims=True)
    fm_out = fo + second
    h = params["feature_embeddings"][x_off].reshape(x.shape[0], DEEP_IN)
    for i in (1, 2, 3):
        h = h @ params[f"w{i}"] + params[f"b{i}"]
        h = ((h - params[f"m{i}"]) / jnp.sqrt(params[f"v{i}"] + BN_EPS)
             * params[f"g{i}"] + params[f"be{i}"])
        h = jnp.maximum(h, 0.0)
    concat = jnp.concatenate([fm_out, h], axis=1)
    return concat @ params["w_out"] + params["b_out"]


if __name__ == "__main__":
    key = jax.random.PRNGKey(0)
    pkey, xkey = jax.random.split(key)
    params = init_params(pkey)
    ops = prepare_operands(params)          # one-time weight prep (not per-call)

    # deterministic integer feature indices, one column per field
    xkeys = jax.random.split(xkey, NUM_FIELDS)
    cols = [jax.random.randint(xkeys[i], (BATCH,), 0, FIELD_DIMS[i], dtype=jnp.int32)
            for i in range(NUM_FIELDS)]
    x = jnp.stack(cols, axis=1)                                    # (B, F) int32

    out = deepfm_forward(ops, x)
    out = jax.block_until_ready(out)
    assert out.shape == (BATCH, 1) and out.dtype == jnp.float32
    assert bool(jnp.all(jnp.isfinite(out)))

    # correctness vs. f32 reference (tolerance covers the bf16 deep tower)
    ref = reference_forward(params, x)
    max_err = float(jnp.max(jnp.abs(out - ref)))
    assert max_err < 3e-2, f"max abs error {max_err} vs reference"

    print("KERNEL_OK")
</pallas_src>

<mosaic_0001>
module attributes {stable_mosaic.version = 11 : i64} {
  func.func @deepfm_kernel(%arg0: i32, %arg1: memref<256x4xi32, #tpu.memory_space<vmem>>, %arg2: memref<128x128xf32, #tpu.memory_space<vmem>>, %arg3: memref<128x128xbf16, #tpu.memory_space<vmem>>, %arg4: memref<128x128xbf16, #tpu.memory_space<vmem>>, %arg5: memref<128x128xbf16, #tpu.memory_space<vmem>>, %arg6: memref<8x128xf32, #tpu.memory_space<vmem>>, %arg7: memref<1x256xf32, #tpu.memory_space<vmem>>) attributes {dimension_semantics = [#tpu.dimension_semantics<arbitrary>], iteration_bounds = array<i64: 1>, scalar_prefetch = 0 : i64, scratch_operands = 0 : i64, tpu.core_type = #tpu.core_type<tc>, window_params = [{transform_indices = @transform_0, window_bounds = array<i64: 256, 4>}, {pipeline_mode = #tpu.pipeline_mode<synchronous>, transform_indices = @transform_1, window_bounds = array<i64: 128, 128>}, {pipeline_mode = #tpu.pipeline_mode<synchronous>, transform_indices = @transform_2, window_bounds = array<i64: 128, 128>}, {pipeline_mode = #tpu.pipeline_mode<synchronous>, transform_indices = @transform_3, window_bounds = array<i64: 128, 128>}, {pipeline_mode = #tpu.pipeline_mode<synchronous>, transform_indices = @transform_4, window_bounds = array<i64: 128, 128>}, {pipeline_mode = #tpu.pipeline_mode<synchronous>, transform_indices = @transform_5, window_bounds = array<i64: 8, 128>}, {transform_indices = @transform_6, window_bounds = array<i64: 1, 256>}]} {
    %c0 = arith.constant 0 : index
    %c0_0 = arith.constant 0 : index
    %0 = vector.load %arg1[%c0, %c0_0] : memref<256x4xi32, #tpu.memory_space<vmem>>, vector<256x4xi32>
    %1 = tpu.iota {dimensions = array<i32: 1>} : vector<256x128xi32>
    %cst = arith.constant 0.000000e+00 : f32
    %2 = vector.broadcast %cst : f32 to vector<256x128xf32>
    %3 = vector.extract_strided_slice %0 {offsets = [0, 0], sizes = [256, 1], strides = [1, 1]} : vector<256x4xi32> to vector<256x1xi32>
    %c0_i32 = arith.constant 0 : i32
    %4 = vector.broadcast %c0_i32 : i32 to vector<256x1xi32>
    %5 = arith.addi %3, %4 : vector<256x1xi32>
    %6 = vector.broadcast %5 : vector<256x1xi32> to vector<256x128xi32>
    %7 = arith.cmpi eq, %1, %6 : vector<256x128xi32>
    %8 = arith.extui %7 : vector<256x128xi1> to vector<256x128xi32>
    %9 = arith.sitofp %8 : vector<256x128xi32> to vector<256x128xf32>
    %10 = arith.addf %2, %9 : vector<256x128xf32>
    %11 = vector.extract_strided_slice %0 {offsets = [0, 1], sizes = [256, 1], strides = [1, 1]} : vector<256x4xi32> to vector<256x1xi32>
    %c10_i32 = arith.constant 10 : i32
    %12 = vector.broadcast %c10_i32 : i32 to vector<256x1xi32>
    %13 = arith.addi %11, %12 : vector<256x1xi32>
    %14 = vector.broadcast %13 : vector<256x1xi32> to vector<256x128xi32>
    %15 = arith.cmpi eq, %1, %14 : vector<256x128xi32>
    %16 = arith.extui %15 : vector<256x128xi1> to vector<256x128xi32>
    %17 = arith.sitofp %16 : vector<256x128xi32> to vector<256x128xf32>
    %18 = arith.addf %10, %17 : vector<256x128xf32>
    %19 = vector.extract_strided_slice %0 {offsets = [0, 2], sizes = [256, 1], strides = [1, 1]} : vector<256x4xi32> to vector<256x1xi32>
    %c30_i32 = arith.constant 30 : i32
    %20 = vector.broadcast %c30_i32 : i32 to vector<256x1xi32>
    %21 = arith.addi %19, %20 : vector<256x1xi32>
    %22 = vector.broadcast %21 : vector<256x1xi32> to vector<256x128xi32>
    %23 = arith.cmpi eq, %1, %22 : vector<256x128xi32>
    %24 = arith.extui %23 : vector<256x128xi1> to vector<256x128xi32>
    %25 = arith.sitofp %24 : vector<256x128xi32> to vector<256x128xf32>
    %26 = arith.addf %18, %25 : vector<256x128xf32>
    %27 = vector.extract_strided_slice %0 {offsets = [0, 3], sizes = [256, 1], strides = [1, 1]} : vector<256x4xi32> to vector<256x1xi32>
    %c60_i32 = arith.constant 60 : i32
    %28 = vector.broadcast %c60_i32 : i32 to vector<256x1xi32>
    %29 = arith.addi %27, %28 : vector<256x1xi32>
    %30 = vector.broadcast %29 : vector<256x1xi32> to vector<256x128xi32>
    %31 = arith.cmpi eq, %1, %30 : vector<256x128xi32>
    %32 = arith.extui %31 : vector<256x128xi1> to vector<256x128xi32>
    %33 = arith.sitofp %32 : vector<256x128xi32> to vector<256x128xf32>
    %34 = arith.addf %26, %33 : vector<256x128xf32>
    %c0_1 = arith.constant 0 : index
    %c0_2 = arith.constant 0 : index
    %35 = vector.load %arg2[%c0_1, %c0_2] : memref<128x128xf32, #tpu.memory_space<vmem>>, vector<128x128xf32>
    %cst_3 = arith.constant dense<0.000000e+00> : vector<256x128xf32>
    %36 = tpu.matmul %34, %35, %cst_3 {dimension_numbers = #tpu.dot_dimension_numbers<[1], [0], [0], [1], [0, 0, 1, 1], [], []>} : vector<256x128xf32>, vector<128x128xf32>, vector<256x128xf32> -> vector<256x128xf32>
    %37 = arith.truncf %36 : vector<256x128xf32> to vector<256x128xbf16>
    %c0_4 = arith.constant 0 : index
    %c0_5 = arith.constant 0 : index
    %38 = vector.load %arg3[%c0_4, %c0_5] : memref<128x128xbf16, #tpu.memory_space<vmem>>, vector<128x128xbf16>
    %cst_6 = arith.constant dense<0.000000e+00> : vector<256x128xf32>
    %39 = tpu.matmul %37, %38, %cst_6 {dimension_numbers = #tpu.dot_dimension_numbers<[1], [0], [0], [1], [0, 0, 1, 1], [], []>} : vector<256x128xbf16>, vector<128x128xbf16>, vector<256x128xf32> -> vector<256x128xf32>
    %c0_7 = arith.constant 0 : index
    %c0_8 = arith.constant 0 : index
    %40 = vector.load %arg6[%c0_7, %c0_8] : memref<8x128xf32, #tpu.memory_space<vmem>>, vector<1x128xf32>
    %41 = vector.broadcast %40 : vector<1x128xf32> to vector<256x128xf32>
    %42 = arith.addf %39, %41 : vector<256x128xf32>
    %cst_9 = arith.constant 0.000000e+00 : f32
    %43 = vector.broadcast %cst_9 : f32 to vector<256x128xf32>
    %44 = arith.maximumf %42, %43 : vector<256x128xf32>
    %45 = arith.truncf %44 : vector<256x128xf32> to vector<256x128xbf16>
    %c0_10 = arith.constant 0 : index
    %c0_11 = arith.constant 0 : index
    %46 = vector.load %arg4[%c0_10, %c0_11] : memref<128x128xbf16, #tpu.memory_space<vmem>>, vector<128x128xbf16>
    %cst_12 = arith.constant dense<0.000000e+00> : vector<256x128xf32>
    %47 = tpu.matmul %45, %46, %cst_12 {dimension_numbers = #tpu.dot_dimension_numbers<[1], [0], [0], [1], [0, 0, 1, 1], [], []>} : vector<256x128xbf16>, vector<128x128xbf16>, vector<256x128xf32> -> vector<256x128xf32>
    %c1 = arith.constant 1 : index
    %c0_13 = arith.constant 0 : index
    %48 = vector.load %arg6[%c1, %c0_13] : memref<8x128xf32, #tpu.memory_space<vmem>>, vector<1x128xf32>
    %49 = vector.broadcast %48 : vector<1x128xf32> to vector<256x128xf32>
    %50 = arith.addf %47, %49 : vector<256x128xf32>
    %cst_14 = arith.constant 0.000000e+00 : f32
    %51 = vector.broadcast %cst_14 : f32 to vector<256x128xf32>
    %52 = arith.maximumf %50, %51 : vector<256x128xf32>
    %53 = arith.truncf %52 : vector<256x128xf32> to vector<256x128xbf16>
    %c0_15 = arith.constant 0 : index
    %c0_16 = arith.constant 0 : index
    %54 = vector.load %arg5[%c0_15, %c0_16] : memref<128x128xbf16, #tpu.memory_space<vmem>>, vector<128x128xbf16>
    %cst_17 = arith.constant dense<0.000000e+00> : vector<256x128xf32>
    %55 = tpu.matmul %53, %54, %cst_17 {dimension_numbers = #tpu.dot_dimension_numbers<[1], [0], [0], [1], [0, 0, 1, 1], [], []>} : vector<256x128xbf16>, vector<128x128xbf16>, vector<256x128xf32> -> vector<256x128xf32>
    %c2 = arith.constant 2 : index
    %c0_18 = arith.constant 0 : index
    %56 = vector.load %arg6[%c2, %c0_18] : memref<8x128xf32, #tpu.memory_space<vmem>>, vector<1x128xf32>
    %57 = vector.broadcast %56 : vector<1x128xf32> to vector<256x128xf32>
    %58 = arith.addf %55, %57 : vector<256x128xf32>
    %cst_19 = arith.constant 0.000000e+00 : f32
    %59 = vector.broadcast %cst_19 : f32 to vector<256x128xf32>
    %60 = arith.maximumf %58, %59 : vector<256x128xf32>
    %c64_i32 = arith.constant 64 : i32
    %61 = vector.broadcast %c64_i32 : i32 to vector<256x128xi32>
    %62 = arith.cmpi sge, %1, %61 : vector<256x128xi32>
    %c80_i32 = arith.constant 80 : i32
    %63 = vector.broadcast %c80_i32 : i32 to vector<256x128xi32>
    %64 = arith.cmpi slt, %1, %63 : vector<256x128xi32>
    %65 = arith.andi %62, %64 : vector<256x128xi1>
    %66 = arith.mulf %36, %36 : vector<256x128xf32>
    %67 = arith.select %65, %66, %36 : vector<256x128xi1>, vector<256x128xf32>
    %c0_20 = arith.constant 0 : index
    %c0_21 = arith.constant 0 : index
    %68 = vector.load %arg6[%c0_20, %c0_21] : memref<8x128xf32, #tpu.memory_space<vmem>>, vector<8x128xf32>
    %cst_22 = arith.constant dense<0.000000e+00> : vector<8x256xf32>
    %69 = tpu.matmul %68, %60, %cst_22 {dimension_numbers = #tpu.dot_dimension_numbers<[1], [1], [0], [0], [0, 0, 1, 0], [], []>} : vector<8x128xf32>, vector<256x128xf32>, vector<8x256xf32> -> vector<8x256xf32>
    %c0_23 = arith.constant 0 : index
    %c0_24 = arith.constant 0 : index
    %70 = vector.load %arg6[%c0_23, %c0_24] : memref<8x128xf32, #tpu.memory_space<vmem>>, vector<8x128xf32>
    %cst_25 = arith.constant dense<0.000000e+00> : vector<8x256xf32>
    %71 = tpu.matmul %70, %67, %cst_25 {dimension_numbers = #tpu.dot_dimension_numbers<[1], [1], [0], [0], [0, 0, 1, 0], [], []>} : vector<8x128xf32>, vector<256x128xf32>, vector<8x256xf32> -> vector<8x256xf32>
    %72 = vector.extract_strided_slice %69 {offsets = [3, 0], sizes = [1, 256], strides = [1, 1]} : vector<8x256xf32> to vector<1x256xf32>
    %73 = vector.extract_strided_slice %71 {offsets = [4, 0], sizes = [1, 256], strides = [1, 1]} : vector<8x256xf32> to vector<1x256xf32>
    %74 = arith.addf %72, %73 : vector<1x256xf32>
    %c0_26 = arith.constant 0 : index
    %c0_27 = arith.constant 0 : index
    %75 = vector.load %arg7[%c0_26, %c0_27] : memref<1x256xf32, #tpu.memory_space<vmem>>, vector<1x256xf32>
    tpu.vector_store %arg7[%c0_26, %c0_27], %74 {strides = array<i32>} : memref<1x256xf32, #tpu.memory_space<vmem>>, vector<1x256xf32>,
    return
  }
  func.func @transform_0(%arg0: i32) -> (i32, i32) {
    %c0_i32 = arith.constant 0 : i32
    %c0_i32_0 = arith.constant 0 : i32
    return %arg0, %c0_i32 : i32, i32
  }
  func.func @transform_1(%arg0: i32) -> (i32, i32) {
    %c0_i32 = arith.constant 0 : i32
    %c0_i32_0 = arith.constant 0 : i32
    %c0_i32_1 = arith.constant 0 : i32
    return %c0_i32, %c0_i32_0 : i32, i32
  }
  func.func @transform_2(%arg0: i32) -> (i32, i32) {
    %c0_i32 = arith.constant 0 : i32
    %c0_i32_0 = arith.constant 0 : i32
    %c0_i32_1 = arith.constant 0 : i32
    return %c0_i32, %c0_i32_0 : i32, i32
  }
  func.func @transform_3(%arg0: i32) -> (i32, i32) {
    %c0_i32 = arith.constant 0 : i32
    %c0_i32_0 = arith.constant 0 : i32
    %c0_i32_1 = arith.constant 0 : i32
    return %c0_i32, %c0_i32_0 : i32, i32
  }
  func.func @transform_4(%arg0: i32) -> (i32, i32) {
    %c0_i32 = arith.constant 0 : i32
    %c0_i32_0 = arith.constant 0 : i32
    %c0_i32_1 = arith.constant 0 : i32
    return %c0_i32, %c0_i32_0 : i32, i32
  }
  func.func @transform_5(%arg0: i32) -> (i32, i32) {
    %c0_i32 = arith.constant 0 : i32
    %c0_i32_0 = arith.constant 0 : i32
    %c0_i32_1 = arith.constant 0 : i32
    return %c0_i32, %c0_i32_0 : i32, i32
  }
  func.func @transform_6(%arg0: i32) -> (i32, i32) {
    %c0_i32 = arith.constant 0 : i32
    %c0_i32_0 = arith.constant 0 : i32
    return %arg0, %c0_i32 : i32, i32
  }
}

</mosaic_0001>

<bundles_post_ra>
// kernel: deepfm_forward.1
= control target key start
LH: loop header
LB: loop body
LE: loop exit
PB: predicated region body
PF: predicated region fallthrough
CT: control target
= control target key end

     0   :  { %11 = vsyncpa [#allocation3], 0  ;;  %s4321_s0 = inlined_call_operand.vmem [shape: s32[256,4], index: 0, kind: input, shape index: {}]   ;;  %s4322_s1 = inlined_call_operand.vmem [shape: f32[128,128], index: 1, kind: input, shape index: {}]   ;;  %s4323_s2 = inlined_call_operand.vmem [shape: bf16[128,128], index: 2, kind: input, shape index: {}]   ;;  %s4324_s3 = inlined_call_operand.vmem [shape: bf16[128,128], index: 3, kind: input, shape index: {}]   ;;  %s4325_s4 = inlined_call_operand.hbm [shape: bf16[128,128], index: 4, kind: input, shape index: {}]   ;;  %s4326_s5 = inlined_call_operand.vmem [shape: f32[8,128], index: 5, kind: input, shape index: {}]   ;;  %s4327_s6 = inlined_call_operand.hbm [shape: f32[1,256], index: 6, kind: output, shape index: {}]  }
   0x1   :  { %12 = vsyncpa [#allocation4], 0  ;;  %s3223_s21 = smov [#allocation2]   ;;  %s3175_s25 = scalar_lea.hbm %s4325_s4, 1024 }
   0x2   :  { %s26_s22 = sshll.u32 %s3223_s21, 4  ;;  %p3176_p0 = scmp.ne.s32.totalorder %s4325_s4, %s3175_s25  ;;  %s27_s22 = int_to_ptr.vmem [resolvable:$true] %s26_s22 }
   0x3   :  { %p3179_p1 = scmp.lt.u32.totalorder %s3175_s25, %s4325_s4 }
   0x5   :  { %p3181_p2 = pnand %p3179_p1, %p3176_p0 }
   0x7   :  { %3184 = shalt.err (!%p3181_p2)
}
   0x8   :  { %s3185_s30 = scalar_lea.vmem %s27_s22, 1024  ;;  %p3190_p4 = scmp.lt.s32.totalorder %s27_s22, %s27_s22 }
   0x9   :  { %p3186_p3 = scmp.ne.s32.totalorder %s27_s22, %s3185_s30  ;;  %p3191_p5 = scmp.lt.s32.totalorder %s3185_s30, %s3185_s30 }
   0xb   :  { %p3192_p6 = por %p3191_p5, %p3190_p4 }
   0xd   :  { %p3193_p7 = pnand %p3192_p6, %p3186_p3 }
   0xf   :  { %3196 = shalt.err (!%p3193_p7)
}
  0x10   :  { %s3224_s7 = smov 64   ;;  %s3225_s8 = smov 4  }
  0x11   :  { %32 = dma.hbm_to_vmem [thread:$0]  %s4325_s4, 1024, %s27_s22, [#allocation3], %s3224_s7, %s3224_s7, %s3225_s8  }
  0x12   :  { %3219 = dma.done.wait [#allocation3], 1024  }
  0x13   :  { %3220 = vsyncadd [#allocation3], 4294966272  ;;  %v3226_v0 = vmov 0   ;;  %v3285_v1 = vld [vmem:[%s4321_s0 + $0x8] sm:$0xff]  ;;  %v3290_v2 = vld [vmem:[%s4321_s0] sm:$0xff]  ;;  %v3227_v5 = vmov 1  }
  0x14   :  { %3072 = vset.pattern.permute.xlu1 %v3226_v0  ;;  %3071 = vset.pattern.permute.xlu0 %v3226_v0  ;;  %v298_v3 = vadd.s32 10, %v3285_v1  ;;  %v297_v4 = vadd.s32 10, %v3290_v2  ;;  %v553_v6 = vadd.s32 30, %v3290_v2  ;;  %v554_v7 = vadd.s32 30, %v3285_v1  ;;  %v3303_v8 = vld [vmem:[%s4321_s0 + $0x18] sm:$0xff]  ;;  %v3308_v9 = vld [vmem:[%s4321_s0 + $0x28] sm:$0xff] }
  0x15   :  { %77 = vperm.xlu1 %3072, %v3285_v1   ;;  %74 = vperm.xlu0 %3071, %v3290_v2   ;;  %v3228_v10 = vmov 2   ;;  %v556_v11 = vadd.s32 30, %v3303_v8  ;;  %v3316_v12 = vld [vmem:[%s4321_s0 + $0x10] sm:$0xff]  ;;  %v558_v13 = vadd.s32 30, %v3308_v9  ;;  %v3322_v14 = vld [vmem:[%s4321_s0 + $0x38] sm:$0xff]  ;;  %v3328_v16 = vld [vmem:[%s4321_s0 + $0x48] sm:$0xff] }
  0x16   :  { %v299_v15 = vadd.s32 10, %v3316_v12  ;;  %v560_v17 = vadd.s32 30, %v3322_v14  ;;  %v562_v18 = vadd.s32 30, %v3328_v16  ;;  %v3338_v19 = vld [vmem:[%s4321_s0 + $0x58] sm:$0xff]  ;;  %v1065_v20 = vld [vmem:[%s4322_s1] sm:$0xff]  ;;  %v1066_v21 = vld [vmem:[%s4322_s1 + $0x8] sm:$0xff] }
  0x17   :  { %v2965_v22 = vpack.c.bf16 %v1066_v21, %v1065_v20  ;;  %v300_v23 = vadd.s32 10, %v3303_v8  ;;  %v564_v24 = vadd.s32 30, %v3338_v19  ;;  %v3353_v25 = vld [vmem:[%s4321_s0 + $0x68] sm:$0xff]  ;;  %v1067_v26 = vld [vmem:[%s4322_s1 + $0x10] sm:$0xff]  ;;  %v1068_v27 = vld [vmem:[%s4322_s1 + $0x18] sm:$0xff]  ;;  %v555_v30 = vadd.s32 30, %v3316_v12 }
  0x18   :  { %v2969_v28 = vpack.c.bf16 %v1068_v27, %v1067_v26  ;;  %v566_v29 = vadd.s32 30, %v3353_v25  ;;  %v3367_v31 = vld [vmem:[%s4321_s0 + $0x78] sm:$0xff]  ;;  %v1069_v32 = vld [vmem:[%s4322_s1 + $0x20] sm:$0xff]  ;;  %v1070_v33 = vld [vmem:[%s4322_s1 + $0x28] sm:$0xff]  ;;  %v809_v51 = vadd.s32 60, %v3290_v2  ;;  %v3229_v55 = vmov 3  }
  0x19   :  { %3074 = vset.pattern.permute.xlu1 %v3227_v5  ;;  %3073 = vset.pattern.permute.xlu0 %v3227_v5  ;;  %v2973_v34 = vpack.c.bf16 %v1070_v33, %v1069_v32  ;;  %v568_v35 = vadd.s32 30, %v3367_v31  ;;  %v3380_v36 = vld [vmem:[%s4321_s0 + $0x88] sm:$0xff]  ;;  %v1071_v37 = vld [vmem:[%s4322_s1 + $0x30] sm:$0xff]  ;;  %v1072_v38 = vld [vmem:[%s4322_s1 + $0x38] sm:$0xff]  ;;  %v302_v56 = vadd.s32 10, %v3308_v9  ;;  %v810_v57 = vadd.s32 60, %v3285_v1 }
  0x1a   :  { %333 = vperm.xlu1 %3074, %v298_v3   ;;  %330 = vperm.xlu0 %3073, %v297_v4   ;;  %v43_v39 = vld [vmem:[%s4321_s0 + $0x20] sm:$0xff]  ;;  %v2977_v40 = vpack.c.bf16 %v1072_v38, %v1071_v37  ;;  %v570_v41 = vadd.s32 30, %v3380_v36  ;;  %v3396_v42 = vld [vmem:[%s4321_s0 + $0x98] sm:$0xff]  ;;  %v1074_v44 = vld [vmem:[%s4322_s1 + $0x48] sm:$0xff]  ;;  %v811_v61 = vadd.s32 60, %v3316_v12  ;;  %v812_v63 = vadd.s32 60, %v3303_v8 }
  0x1b   :  { %2966 = vmatprep.subr.bf16.mxu0 %v2965_v22  ;;  %v1073_v43 = vld [vmem:[%s4322_s1 + $0x40] sm:$0xff]  ;;  %v301_v45 = vadd.s32 10, %v43_v39  ;;  %v572_v47 = vadd.s32 30, %v3396_v42  ;;  %v1075_v48 = vld [vmem:[%s4322_s1 + $0x50] sm:$0xff]  ;;  %v1076_v49 = vld [vmem:[%s4322_s1 + $0x58] sm:$0xff]  ;;  %v557_v62 = vadd.s32 30, %v43_v39 }
  0x1c   :  { %2968 = vmatpush3.bf16.msra.mxu0 %v2965_v22  ;;  %v2981_v46 = vpack.c.bf16 %v1074_v44, %v1073_v43  ;;  %v2985_v50 = vpack.c.bf16 %v1076_v49, %v1075_v48  ;;  %v1077_v52 = vld [vmem:[%s4322_s1 + $0x60] sm:$0xff]  ;;  %v1078_v53 = vld [vmem:[%s4322_s1 + $0x68] sm:$0xff]  ;;  %v1079_v58 = vld [vmem:[%s4322_s1 + $0x70] sm:$0xff]  ;;  %v813_v2 = vadd.s32 60, %v43_v39  ;;  %v814_v4 = vadd.s32 60, %v3308_v9 }
  0x1d   :  { %2970 = vmatprep.subr.bf16.mxu0 %v2969_v28  ;;  %v2989_v54 = vpack.c.bf16 %v1078_v53, %v1077_v52  ;;  %v1080_v59 = vld [vmem:[%s4322_s1 + $0x78] sm:$0xff]  ;;  %v45_v1 = vld [vmem:[%s4321_s0 + $0x30] sm:$0xff]  ;;  %v3459_v20 = vld [vmem:[%s4321_s0 + $0x60] sm:$0xff]  ;;  %v822_v22 = vadd.s32 60, %v3353_v25 }
  0x1e   :  { %3075 = vset.pattern.permute.xlu1 %v3228_v10  ;;  %3076 = vset.pattern.permute.xlu0 %v3228_v10  ;;  %v2993_v60 = vpack.c.bf16 %v1080_v59, %v1079_v58  ;;  %v303_v3 = vadd.s32 10, %v45_v1  ;;  %v821_v21 = vadd.s32 60, %v3459_v20  ;;  %v3486_v33 = vld [vmem:[%s4321_s0 + $0xa8] sm:$0xff]  ;;  %v3512_v44 = vld [vmem:[%s4321_s0 + $0xd0] sm:$0xff]  ;;  %v309_v53 = vadd.s32 10, %v3459_v20 }
  0x1f   :  { %586 = vperm.xlu1 %3075, %v553_v6   ;;  %589 = vperm.xlu0 %3076, %v554_v7   ;;  %v815_v6 = vadd.s32 60, %v45_v1  ;;  %v816_v7 = vadd.s32 60, %v3322_v14  ;;  %v3500_v38 = vld [vmem:[%s4321_s0 + $0xc8] sm:$0xff]  ;;  %v318_v48 = vadd.s32 10, %v3486_v33 }
  0x20   :  { %2972 = vmatpush3.bf16.msra.mxu0 %v2969_v28  ;;  %v824_v28 = vadd.s32 60, %v3367_v31  ;;  %v834_v43 = vadd.s32 60, %v3500_v38 }
  0x21   :  { %2974 = vmatprep.subr.bf16.mxu0 %v2973_v34 }
  0x23   :  { %3077 = vset.pattern.permute.xlu1 %v3226_v0  ;;  %595 = vperm.xlu0 %3076, %v556_v11   ;;  %v47_v11 = vld [vmem:[%s4321_s0 + $0x40] sm:$0xff] }
  0x24   :  { %80 = vperm.xlu1 %3077, %v3316_v12   ;;  %2976 = vmatpush3.bf16.msra.mxu0 %v2973_v34  ;;  %v559_v12 = vadd.s32 30, %v45_v1  ;;  %v561_v27 = vadd.s32 30, %v47_v11  ;;  %v830_v34 = vadd.s32 60, %v3486_v33 }
  0x25   :  { %2978 = vmatprep.subr.bf16.mxu0 %v2977_v40 }
  0x27   :  { %601 = vperm.xlu0 %3076, %v558_v13   ;;  %v818_v13 = vadd.s32 60, %v3328_v16 }
  0x28   :  { %3078 = vset.pattern.permute.xlu1 %v3227_v5  ;;  %2980 = vmatpush3.bf16.msra.mxu0 %v2977_v40 }
  0x29   :  { %336 = vperm.xlu1 %3078, %v299_v15   ;;  %2982 = vmatprep.subr.bf16.mxu0 %v2981_v46 }
  0x2b   :  { %607 = vperm.xlu0 %3076, %v560_v17   ;;  %v305_v17 = vadd.s32 10, %v47_v11 }
  0x2c   :  { %2984 = vmatpush3.bf16.msra.mxu0 %v2981_v46  ;;  %v835_v46 = vadd.s32 60, %v3512_v44 }
  0x2d   :  { %3079 = vset.pattern.permute.xlu1 %v3226_v0  ;;  %2986 = vmatprep.subr.bf16.mxu0 %v2985_v50 }
  0x2e   :  { %83 = vperm.xlu1 %3079, %v3303_v8   ;;  %v304_v8 = vadd.s32 10, %v3322_v14 }
  0x2f   :  { %613 = vperm.xlu0 %3076, %v562_v18   ;;  %v820_v18 = vadd.s32 60, %v3338_v19 }
  0x30   :  { %2988 = vmatpush3.bf16.msra.mxu0 %v2985_v50 }
  0x31   :  { %2990 = vmatprep.subr.bf16.mxu0 %v2989_v54 }
  0x32   :  { %3080 = vset.pattern.permute.xlu1 %v3227_v5 }
  0x33   :  { %339 = vperm.xlu1 %3080, %v300_v23   ;;  %619 = vperm.xlu0 %3076, %v564_v24   ;;  %v306_v23 = vadd.s32 10, %v3328_v16  ;;  %v3469_v24 = vld [vmem:[%s4321_s0 + $0x70] sm:$0xff] }
  0x34   :  { %2992 = vmatpush3.bf16.msra.mxu0 %v2989_v54  ;;  %v823_v26 = vadd.s32 60, %v3469_v24  ;;  %v3534_v54 = vld [vmem:[%s4321_s0 + $0xe8] sm:$0xff] }
  0x35   :  { %2994 = vmatprep.subr.bf16.mxu0 %v2993_v60 }
  0x37   :  { %3081 = vset.pattern.permute.xlu1 %v3228_v10  ;;  %625 = vperm.xlu0 %3076, %v566_v29  }
  0x38   :  { %592 = vperm.xlu1 %3081, %v555_v30   ;;  %2996 = vmatpush3.bf16.msra.mxu0 %v2993_v60  ;;  %v826_v30 = vadd.s32 60, %v3380_v36 }
  0x3b   :  { %631 = vperm.xlu0 %3076, %v568_v35   ;;  %v3493_v35 = vld [vmem:[%s4321_s0 + $0xb0] sm:$0xff] }
  0x3c   :  { %3082 = vset.pattern.permute.xlu1 %v3226_v0  ;;  %v831_v37 = vadd.s32 60, %v3493_v35 }
  0x3d   :  { %86 = vperm.xlu1 %3082, %v43_v39   ;;  %v308_v39 = vadd.s32 10, %v3338_v19 }
  0x3f   :  { %637 = vperm.xlu0 %3076, %v570_v41  }
  0x41   :  { %3083 = vset.pattern.permute.xlu1 %v3227_v5 }
  0x42   :  { %342 = vperm.xlu1 %3083, %v301_v45  }
  0x43   :  { %643 = vperm.xlu0 %3076, %v572_v47  }
  0x46   :  { %3084 = vset.pattern.permute.xlu1 %v3226_v0 }
  0x47   :  { %89 = vperm.xlu1 %3084, %v3308_v9   ;;  %3122 = vset.pattern.permute.xlu0 %v3229_v55  ;;  %v817_v9 = vadd.s32 60, %v47_v11 }
  0x48   :  { %842 = vperm.xlu0 %3122, %v809_v51   ;;  %v322_v51 = vadd.s32 10, %v3500_v38 }
  0x4b   :  { %3085 = vset.pattern.permute.xlu1 %v3227_v5 }
  0x4c   :  { %345 = vperm.xlu1 %3085, %v302_v56   ;;  %845 = vperm.xlu0 %3122, %v810_v57   ;;  %v326_v57 = vadd.s32 10, %v3534_v54 }
  0x50   :  { %3086 = vset.pattern.permute.xlu1 %v3228_v10  ;;  %848 = vperm.xlu0 %3122, %v811_v61   ;;  %v310_v61 = vadd.s32 10, %v3353_v25 }
  0x51   :  { %598 = vperm.xlu1 %3086, %v557_v62  }
  0x54   :  { %851 = vperm.xlu0 %3122, %v812_v63   ;;  %v3555_v63 = vld [vmem:[%s4321_s0 + $0xa0] sm:$0xff] }
  0x55   :  { %3087 = vset.pattern.permute.xlu1 %v3226_v0 }
  0x56   :  { %92 = vperm.xlu1 %3087, %v45_v1  }
  0x58   :  { %854 = vperm.xlu0 %3122, %v813_v2   ;;  %v565_v2 = vadd.s32 30, %v3459_v20 }
  0x5a   :  { %3088 = vset.pattern.permute.xlu1 %v3227_v5 }
  0x5b   :  { %348 = vperm.xlu1 %3088, %v303_v3  }
  0x5c   :  { %857 = vperm.xlu0 %3122, %v814_v4   ;;  %v3571_v4 = vld [vmem:[%s4321_s0 + $0xb8] sm:$0xff] }
  0x5f   :  { %3089 = vset.pattern.permute.xlu1 %v3226_v0 }
  0x60   :  { %95 = vperm.xlu1 %3089, %v3322_v14   ;;  %860 = vperm.xlu0 %3122, %v815_v6   ;;  %v49_v14 = vld [vmem:[%s4321_s0 + $0x50] sm:$0xff] }
  0x61   :  { %v819_v15 = vadd.s32 60, %v49_v14  ;;  %v307_v32 = vadd.s32 10, %v49_v14  ;;  %v563_v45 = vadd.s32 30, %v49_v14 }
  0x64   :  { %3090 = vset.pattern.permute.xlu1 %v3227_v5  ;;  %863 = vperm.xlu0 %3122, %v816_v7  }
  0x65   :  { %351 = vperm.xlu1 %3090, %v304_v8   ;;  %v71_v8 = vlaneseq }
  0x68   :  { %866 = vperm.xlu0 %3122, %v817_v9   ;;  %v311_v9 = vadd.s32 10, %v3469_v24 }
  0x69   :  { %3091 = vset.pattern.permute.xlu1 %v3228_v10 }
  0x6a   :  { %604 = vperm.xlu1 %3091, %v559_v12   ;;  %v3584_v12 = vld [vmem:[%s4321_s0 + $0xc0] sm:$0xff] }
  0x6c   :  { %869 = vperm.xlu0 %3122, %v818_v13   ;;  %v3587_v13 = vand.u32 127, %v71_v8 }
  0x6e   :  { %3092 = vset.pattern.permute.xlu1 %v3226_v0 }
  0x6f   :  { %98 = vperm.xlu1 %3092, %v47_v11  }
  0x70   :  { %872 = vperm.xlu0 %3122, %v819_v15  }
  0x73   :  { %3093 = vset.pattern.permute.xlu1 %v3227_v5 }
  0x74   :  { %354 = vperm.xlu1 %3093, %v305_v17   ;;  %875 = vperm.xlu0 %3122, %v820_v18   ;;  %v3230_v17 = vmov 0.0  }
  0x78   :  { %3094 = vset.pattern.permute.xlu1 %v3226_v0  ;;  %878 = vperm.xlu0 %3122, %v821_v21  }
  0x79   :  { %101 = vperm.xlu1 %3094, %v3328_v16   ;;  %v3478_v16 = vld [vmem:[%s4321_s0 + $0x80] sm:$0xff] }
  0x7a   :  { %v825_v29 = vadd.s32 60, %v3478_v16 }
  0x7c   :  { %881 = vperm.xlu0 %3122, %v822_v22  }
  0x7d   :  { %3095 = vset.pattern.permute.xlu1 %v3227_v5 }
  0x7e   :  { %357 = vperm.xlu1 %3095, %v306_v23  }
  0x80   :  { %884 = vperm.xlu0 %3122, %v823_v26  }
  0x82   :  { %3096 = vset.pattern.permute.xlu1 %v3228_v10 }
  0x83   :  { %610 = vperm.xlu1 %3096, %v561_v27   ;;  %v312_v27 = vadd.s32 10, %v3367_v31 }
  0x84   :  { %887 = vperm.xlu0 %3122, %v824_v28  }
  0x87   :  { %3097 = vset.pattern.permute.xlu1 %v3226_v0 }
  0x88   :  { %104 = vperm.xlu1 %3097, %v49_v14   ;;  %890 = vperm.xlu0 %3122, %v825_v29  }
  0x8c   :  { %3098 = vset.pattern.permute.xlu1 %v3227_v5  ;;  %893 = vperm.xlu0 %3122, %v826_v30  }
  0x8d   :  { %360 = vperm.xlu1 %3098, %v307_v32  }
  0x90   :  { %905 = vperm.xlu0 %3122, %v830_v34  }
  0x91   :  { %3099 = vset.pattern.permute.xlu1 %v3226_v0 }
  0x92   :  { %107 = vperm.xlu1 %3099, %v3338_v19  }
  0x94   :  { %v3504_v40 = vpop.permute.xlu1 %77  ;;  %v3506_v41 = vpop.permute.xlu0 %74  ;;  %908 = vperm.xlu0 %3122, %v831_v37  }
  0x95   :  { %vm169_vm0 = vcmp.eq.s32.totalorder %v3587_v13, %v3506_v41  ;;  %vm170_vm4 = vcmp.eq.s32.totalorder %v3587_v13, %v3504_v40  ;;  %v567_v40 = vadd.s32 30, %v3469_v24 }
  0x96   :  { %3100 = vset.pattern.permute.xlu1 %v3227_v5  ;;  %v2398_v18 = vsel %vm169_vm0, 1.0, %v3230_v17  ;;  %v2399_v32 = vsel %vm170_vm4, 1.0, %v3230_v17 }
  0x97   :  { %363 = vperm.xlu1 %3100, %v308_v39  }
  0x98   :  { %917 = vperm.xlu0 %3122, %v834_v43  }
  0x99   :  { %v3516_v19 = vpop.permute.xlu1 %333  ;;  %v331_v47 = vpop.permute.xlu0 %330 }
  0x9a   :  { %vm425_vm1 = vcmp.eq.s32.totalorder %v3587_v13, %v331_v47  ;;  %vm426_vm3 = vcmp.eq.s32.totalorder %v3587_v13, %v3516_v19 }
  0x9b   :  { %3101 = vset.pattern.permute.xlu1 %v3228_v10  ;;  %v2431_v28 = vsel %vm426_vm3, 1.0, %v3230_v17 }
  0x9c   :  { %616 = vperm.xlu1 %3101, %v563_v45   ;;  %920 = vperm.xlu0 %3122, %v835_v46   ;;  %v522_v37 = vadd.f32 %v2431_v28, %v2399_v32 }
  0x9e   :  { %v3520_v49 = vpop.permute.xlu1 %586  ;;  %v3522_v50 = vpop.permute.xlu0 %589 }
  0x9f   :  { %vm681_vm2 = vcmp.eq.s32.totalorder %v3587_v13, %v3520_v49  ;;  %vm682_vm5 = vcmp.eq.s32.totalorder %v3587_v13, %v3522_v50 }
  0xa0   :  { %3102 = vset.pattern.permute.xlu1 %v3226_v0  ;;  %3139 = vset.pattern.permute.xlu0 %v3227_v5  ;;  %v2462_v26 = vsel %vm681_vm2, 1.0, %v3230_v17 }
  0xa1   :  { %110 = vperm.xlu1 %3102, %v3459_v20   ;;  %393 = vperm.xlu0 %3139, %v318_v48   ;;  %v2430_v20 = vsel %vm425_vm1, 1.0, %v3230_v17 }
  0xa2   :  { %v3528_v52 = vpop.permute.xlu0 %595  ;;  %v521_v23 = vadd.f32 %v2430_v20, %v2398_v18 }
  0xa3   :  { %v3536_v56 = vpop.permute.xlu1 %80  ;;  %vm684_vm13 = vcmp.eq.s32.totalorder %v3587_v13, %v3528_v52 }
  0xa4   :  { %v777_v34 = vadd.f32 %v2462_v26, %v521_v23  ;;  %vm171_vm8 = vcmp.eq.s32.totalorder %v3587_v13, %v3536_v56 }
  0xa5   :  { %3103 = vset.pattern.permute.xlu1 %v3227_v5  ;;  %405 = vperm.xlu0 %3139, %v322_v51  }
  0xa6   :  { %366 = vperm.xlu1 %3103, %v309_v53   ;;  %v3540_v58 = vpop.permute.xlu0 %601 }
  0xa8   :  { %v3542_v59 = vpop.permute.xlu1 %336 }
  0xa9   :  { %417 = vperm.xlu0 %3139, %v326_v57   ;;  %vm427_vm6 = vcmp.eq.s32.totalorder %v3587_v13, %v3542_v59 }
  0xaa   :  { %3104 = vset.pattern.permute.xlu1 %v3226_v0  ;;  %v3545_v60 = vpop.permute.xlu0 %607  ;;  %v2432_v43 = vsel %vm427_vm6, 1.0, %v3230_v17 }
  0xab   :  { %113 = vperm.xlu1 %3104, %v3353_v25  }
  0xad   :  { %v3549_v62 = vpop.permute.xlu1 %83  ;;  %3143 = vset.pattern.permute.xlu0 %v3226_v0 }
  0xae   :  { %v3557_v1 = vpop.permute.xlu0 %613  ;;  %134 = vperm.xlu0 %3143, %v3555_v63   ;;  %vm172_vm11 = vcmp.eq.s32.totalorder %v3587_v13, %v3549_v62  ;;  %v2465_v62 = vsel %vm684_vm13, 1.0, %v3230_v17 }
  0xaf   :  { %3105 = vset.pattern.permute.xlu1 %v3227_v5  ;;  %v2401_v53 = vsel %vm172_vm11, 1.0, %v3230_v17 }
  0xb0   :  { %369 = vperm.xlu1 %3105, %v310_v61  }
  0xb2   :  { %v3562_v3 = vpop.permute.xlu1 %339  ;;  %v3564_v25 = vpop.permute.xlu0 %619  ;;  %140 = vperm.xlu0 %3143, %v3493_v35  }
  0xb3   :  { %vm428_vm9 = vcmp.eq.s32.totalorder %v3587_v13, %v3562_v3 }
  0xb4   :  { %3106 = vset.pattern.permute.xlu1 %v3228_v10  ;;  %v2433_v47 = vsel %vm428_vm9, 1.0, %v3230_v17 }
  0xb5   :  { %622 = vperm.xlu1 %3106, %v565_v2   ;;  %v524_v57 = vadd.f32 %v2433_v47, %v2401_v53 }
  0xb6   :  { %v3573_v6 = vpop.permute.xlu0 %625  ;;  %143 = vperm.xlu0 %3143, %v3571_v4  }
  0xb7   :  { %v593_v7 = vpop.permute.xlu1 %592 }
  0xb8   :  { %vm683_vm10 = vcmp.eq.s32.totalorder %v3587_v13, %v593_v7 }
  0xb9   :  { %3107 = vset.pattern.permute.xlu1 %v3226_v0  ;;  %v2464_v48 = vsel %vm683_vm10, 1.0, %v3230_v17  ;;  %vm688_vm10 = vcmp.eq.s32.totalorder %v3587_v13, %v3545_v60  ;;  %v3703_v60 = vld [vmem:[%s4321_s0 + $0xf0] sm:$0xff] }
  0xba   :  { %116 = vperm.xlu1 %3107, %v3469_v24   ;;  %v3578_v11 = vpop.permute.xlu0 %631  ;;  %146 = vperm.xlu0 %3143, %v3584_v12   ;;  %v2400_v24 = vsel %vm171_vm8, 1.0, %v3230_v17 }
  0xbb   :  { %v523_v50 = vadd.f32 %v2432_v43, %v2400_v24 }
  0xbc   :  { %v3589_v14 = vpop.permute.xlu1 %86 }
  0xbd   :  { %v779_v59 = vadd.f32 %v2464_v48, %v523_v50  ;;  %vm173_vm0 = vcmp.eq.s32.totalorder %v3587_v13, %v3589_v14  ;;  %v313_v14 = vadd.s32 10, %v3478_v16  ;;  %v569_v48 = vadd.s32 30, %v3478_v16  ;;  %v3687_v50 = vld [vmem:[%s4321_s0 + $0xe0] sm:$0xff] }
  0xbe   :  { %3108 = vset.pattern.permute.xlu1 %v3227_v5  ;;  %v3596_v15 = vpop.permute.xlu0 %637  ;;  %152 = vperm.xlu0 %3143, %v3512_v44   ;;  %v2402_v18 = vsel %vm173_vm0, 1.0, %v3230_v17 }
  0xbf   :  { %372 = vperm.xlu1 %3108, %v311_v9   ;;  %v780_v9 = vadd.f32 %v2465_v62, %v524_v57  ;;  %v2469_v57 = vsel %vm688_vm10, 1.0, %v3230_v17  ;;  %v57_v62 = vld [vmem:[%s4321_s0 + $0x90] sm:$0xff]  ;;  %vm692_vm10 = vcmp.eq.s32.totalorder %v3587_v13, %v3564_v25  ;;  %v3154_v25 = vld [vmem:[%s4323_s2 + $0x18] sm:$0xff]  }
  0xc1   :  { %v343_v21 = vpop.permute.xlu1 %342 }
  0xc2   :  { %v3603_v22 = vpop.permute.xlu0 %643  ;;  %vm429_vm14 = vcmp.eq.s32.totalorder %v3587_v13, %v343_v21 }
  0xc3   :  { %3109 = vset.pattern.permute.xlu1 %v3226_v0  ;;  %v2434_v3 = vsel %vm429_vm14, 1.0, %v3230_v17 }
  0xc4   :  { %119 = vperm.xlu1 %3109, %v3367_v31   ;;  %v2463_v31 = vsel %vm682_vm5, 1.0, %v3230_v17  ;;  %vm686_vm5 = vcmp.eq.s32.totalorder %v3587_v13, %v3540_v58 }
  0xc5   :  { %v778_v19 = vadd.f32 %v2463_v31, %v522_v37  ;;  %v3670_v37 = vld [vmem:[%s4321_s0 + $0xd8] sm:$0xff]  ;;  %v2467_v58 = vsel %vm686_vm5, 1.0, %v3230_v17 }
  0xc6   :  { %v3616_v29 = vpop.permute.xlu1 %89  ;;  %155 = vperm.xlu0 %3143, %v3670_v37  }
  0xc7   :  { %v843_v30 = vpop.permute.xlu0 %842  ;;  %vm174_vm3 = vcmp.eq.s32.totalorder %v3587_v13, %v3616_v29 }
  0xc8   :  { %vm937_vm7 = vcmp.eq.s32.totalorder %v3587_v13, %v843_v30  ;;  %3110 = vset.pattern.permute.xlu1 %v3227_v5  ;;  %v2403_v29 = vsel %vm174_vm3, 1.0, %v3230_v17 }
  0xc9   :  { %375 = vperm.xlu1 %3110, %v312_v27   ;;  %v2494_v39 = vsel %vm937_vm7, 1.0, %v3230_v17  ;;  %v525_v27 = vadd.f32 %v2434_v3, %v2402_v18  ;;  %v3719_v18 = vld [vmem:[%s4321_s0 + $0xf8] sm:$0xff] }
  0xca   :  { %v1033_v41 = vadd.f32 %v2494_v39, %v777_v34  ;;  %158 = vperm.xlu0 %3143, %v3687_v50  }
  0xcb   :  { %v346_v45 = vpop.permute.xlu1 %345  ;;  %v846_v46 = vpop.permute.xlu0 %845 }
  0xcc   :  { %vm938_vm12 = vcmp.eq.s32.totalorder %v3587_v13, %v846_v46  ;;  %2773 = vmatprep.mubr.f32.mxu0 %v1033_v41  ;;  %vm430_vm1 = vcmp.eq.s32.totalorder %v3587_v13, %v346_v45 }
  0xcd   :  { %v2495_v49 = vsel %vm938_vm12, 1.0, %v3230_v17  ;;  %3111 = vset.pattern.permute.xlu1 %v3228_v10  ;;  %v2435_v20 = vsel %vm430_vm1, 1.0, %v3230_v17 }
  0xce   :  { %v1034_v51 = vadd.f32 %v2495_v49, %v778_v19  ;;  %628 = vperm.xlu1 %3111, %v567_v40   ;;  %v526_v32 = vadd.f32 %v2435_v20, %v2403_v29  ;;  %v314_v19 = vadd.s32 10, %v3380_v36  ;;  %164 = vperm.xlu0 %3143, %v3703_v60   ;;  %v315_v20 = vadd.s32 10, %v57_v62 }
  0xcf   :  { %v849_v56 = vpop.permute.xlu0 %848 }
  0xd0   :  { %vm939_vm15 = vcmp.eq.s32.totalorder %v3587_v13, %v849_v56  ;;  %v599_v61 = vpop.permute.xlu1 %598  ;;  %2774 = vmatmul.mubr.f32.vlgmr.msra.gmra.mrb[0].mxu0 %v1034_v51  ;;  %v782_v43 = vadd.f32 %v2467_v58, %v526_v32  ;;  %v571_v32 = vadd.s32 30, %v57_v62 }
  0xd1   :  { %v2496_v2 = vsel %vm939_vm15, 1.0, %v3230_v17  ;;  %vm685_vm2 = vcmp.eq.s32.totalorder %v3587_v13, %v599_v61 }
  0xd2   :  { %v1035_v52 = vadd.f32 %v2496_v2, %v779_v59  ;;  %3112 = vset.pattern.permute.xlu1 %v3226_v0  ;;  %v2466_v21 = vsel %vm685_vm2, 1.0, %v3230_v17  ;;  %167 = vperm.xlu0 %3143, %v3719_v18   ;;  %vm690_vm2 = vcmp.eq.s32.totalorder %v3587_v13, %v3557_v1  ;;  %v827_v1 = vadd.s32 60, %v57_v62 }
  0xd3   :  { %122 = vperm.xlu1 %3112, %v3478_v16   ;;  %v852_v7 = vpop.permute.xlu0 %851  ;;  %v781_v34 = vadd.f32 %v2466_v21, %v525_v27 }
  0xd4   :  { %vm940_vm4 = vcmp.eq.s32.totalorder %v3587_v13, %v852_v7  ;;  %2776 = vmatprep.mubr.f32.mxu0 %v1035_v52 }
  0xd5   :  { %v2497_v23 = vsel %vm940_vm4, 1.0, %v3230_v17  ;;  %v93_v26 = vpop.permute.xlu1 %92 }
  0xd6   :  { %v1036_v28 = vadd.f32 %v2497_v23, %v780_v9  ;;  %vm175_vm12 = vcmp.eq.s32.totalorder %v3587_v13, %v93_v26  ;;  %3148 = vset.pattern.permute.xlu0 %v3229_v55 }
  0xd7   :  { %3113 = vset.pattern.permute.xlu1 %v3227_v5  ;;  %v855_v30 = vpop.permute.xlu0 %854  ;;  %v2404_v59 = vsel %vm175_vm12, 1.0, %v3230_v17 }
  0xd8   :  { %vm941_vm6 = vcmp.eq.s32.totalorder %v3587_v13, %v855_v30  ;;  %378 = vperm.xlu1 %3113, %v313_v14   ;;  %2777 = vmatmul.mubr.f32.gmra.mrb[2].mxu0 %v1036_v28  ;;  %v316_v28 = vadd.s32 10, %v3396_v42 }
  0xd9   :  { %v2498_v31 = vsel %vm941_vm6, 1.0, %v3230_v17 }
  0xda   :  { %v1037_v39 = vadd.f32 %v2498_v31, %v781_v34  ;;  %v349_v40 = vpop.permute.xlu1 %348  ;;  %v838_v34 = vadd.s32 60, %v3534_v54 }
  0xdb   :  { %v858_v41 = vpop.permute.xlu0 %857  ;;  %vm431_vm9 = vcmp.eq.s32.totalorder %v3587_v13, %v349_v40 }
  0xdc   :  { %vm942_vm7 = vcmp.eq.s32.totalorder %v3587_v13, %v858_v41  ;;  %3114 = vset.pattern.permute.xlu1 %v3226_v0  ;;  %2779 = vmatprep.mubr.f32.mxu0 %v1037_v39  ;;  %v2436_v53 = vsel %vm431_vm9, 1.0, %v3230_v17 }
  0xdd   :  { %v2499_v45 = vsel %vm942_vm7, 1.0, %v3230_v17  ;;  %125 = vperm.xlu1 %3114, %v3380_v36   ;;  %v527_v2 = vadd.f32 %v2436_v53, %v2404_v59  ;;  %929 = vperm.xlu0 %3148, %v838_v34   ;;  %v317_v59 = vadd.s32 10, %v3555_v63 }
  0xde   :  { %v1038_v46 = vadd.f32 %v2499_v45, %v782_v43  ;;  %v2471_v45 = vsel %vm690_vm2, 1.0, %v3230_v17  ;;  %vm694_vm2 = vcmp.eq.s32.totalorder %v3587_v13, %v3573_v6 }
  0xdf   :  { %v96_v24 = vpop.permute.xlu1 %95  ;;  %v861_v47 = vpop.permute.xlu0 %860 }
  0xe0   :  { %2780 = vmatmul.mubr.f32.gmra.mrb[4].mxu0 %v1038_v46  ;;  %vm176_vm8 = vcmp.eq.s32.totalorder %v3587_v13, %v96_v24  ;;  %vm943_vm13 = vcmp.eq.s32.totalorder %v3587_v13, %v861_v47 }
  0xe1   :  { %3115 = vset.pattern.permute.xlu1 %v3227_v5  ;;  %v2405_v36 = vsel %vm176_vm8, 1.0, %v3230_v17  ;;  %v2500_v52 = vsel %vm943_vm13, 1.0, %v3230_v17 }
  0xe2   :  { %381 = vperm.xlu1 %3115, %v314_v19  }
  0xe3   :  { %v864_v51 = vpop.permute.xlu0 %863 }
  0xe4   :  { %v352_v49 = vpop.permute.xlu1 %351  ;;  %vm944_vm14 = vcmp.eq.s32.totalorder %v3587_v13, %v864_v51  ;;  %v828_v51 = vadd.s32 60, %v3396_v42 }
  0xe5   :  { %vm432_vm11 = vcmp.eq.s32.totalorder %v3587_v13, %v352_v49  ;;  %v2501_v9 = vsel %vm944_vm14, 1.0, %v3230_v17 }
  0xe6   :  { %v2437_v16 = vsel %vm432_vm11, 1.0, %v3230_v17  ;;  %3116 = vset.pattern.permute.xlu1 %v3228_v10 }
  0xe7   :  { %v528_v56 = vadd.f32 %v2437_v16, %v2405_v36  ;;  %634 = vperm.xlu1 %3116, %v569_v48   ;;  %v867_v30 = vpop.permute.xlu0 %866 }
  0xe8   :  { %vm945_vm5 = vcmp.eq.s32.totalorder %v3587_v13, %v867_v30 }
  0xe9   :  { %v605_v61 = vpop.permute.xlu1 %604  ;;  %v784_v3 = vadd.f32 %v2469_v57, %v528_v56  ;;  %v2502_v47 = vsel %vm945_vm5, 1.0, %v3230_v17 }
  0xea   :  { %vm687_vm15 = vcmp.eq.s32.totalorder %v3587_v13, %v605_v61 }
  0xeb   :  { %v2468_v7 = vsel %vm687_vm15, 1.0, %v3230_v17  ;;  %3117 = vset.pattern.permute.xlu1 %v3226_v0  ;;  %v1040_v26 = vadd.f32 %v2501_v9, %v784_v3  ;;  %v870_v40 = vpop.permute.xlu0 %869  ;;  %v3153_v9 = vld [vmem:[%s4323_s2 + $0x10] sm:$0xff]  }
  0xec   :  { %v783_v14 = vadd.f32 %v2468_v7, %v527_v2  ;;  %128 = vperm.xlu1 %3117, %v57_v62   ;;  %vm946_vm6 = vcmp.eq.s32.totalorder %v3587_v13, %v870_v40  ;;  %v3151_v62 = vld [vmem:[%s4323_s2] sm:$0xff]   ;;  %v573_v7 = vadd.s32 30, %v3555_v63 }
  0xed   :  { %v2503_v36 = vsel %vm946_vm6, 1.0, %v3230_v17  ;;  %2821 = vmatprep.subr.bf16.mxu1 %v3151_v62  ;;  %v3155_v40 = vld [vmem:[%s4323_s2 + $0x20] sm:$0xff]  }
  0xee   :  { %v99_v21 = vpop.permute.xlu1 %98  ;;  %v1039_v23 = vadd.f32 %v2500_v52, %v783_v14  ;;  %2822 = vmatpush3.bf16.msra.mxu1 %v3151_v62  ;;  %v3152_v52 = vld [vmem:[%s4323_s2 + $0x8] sm:$0xff]  }
  0xef   :  { %vm177_vm4 = vcmp.eq.s32.totalorder %v3587_v13, %v99_v21  ;;  %v873_v3 = vpop.permute.xlu0 %872  ;;  %2823 = vmatprep.subr.bf16.mxu1 %v3152_v52 }
  0xf0   :  { %3118 = vset.pattern.permute.xlu1 %v3227_v5  ;;  %2782 = vmatprep.mubr.f32.mxu0 %v1039_v23  ;;  %v2406_v46 = vsel %vm177_vm4, 1.0, %v3230_v17  ;;  %vm947_vm13 = vcmp.eq.s32.totalorder %v3587_v13, %v873_v3  ;;  %v832_v3 = vadd.s32 60, %v3571_v4 }
  0xf1   :  { %384 = vperm.xlu1 %3118, %v315_v20   ;;  %2783 = vmatmul.mubr.f32.gmra.mrb[6].mxu0 %v1040_v26  ;;  %v574_v26 = vadd.s32 30, %v3486_v33 }
  0xf2   :  { %2824 = vmatpush3.bf16.msra.mxu1 %v3152_v52 }
  0xf3   :  { %v355_v27 = vpop.permute.xlu1 %354  ;;  %2825 = vmatprep.subr.bf16.mxu1 %v3153_v9  ;;  %v876_v23 = vpop.permute.xlu0 %875 }
  0xf4   :  { %vm433_vm1 = vcmp.eq.s32.totalorder %v3587_v13, %v355_v27  ;;  %vm948_vm14 = vcmp.eq.s32.totalorder %v3587_v13, %v876_v23 }
  0xf5   :  { %3119 = vset.pattern.permute.xlu1 %v3226_v0  ;;  %v2438_v41 = vsel %vm433_vm1, 1.0, %v3230_v17 }
  0xf6   :  { %131 = vperm.xlu1 %3119, %v3396_v42   ;;  %v529_v24 = vadd.f32 %v2438_v41, %v2406_v46  ;;  %v839_v42 = vadd.s32 60, %v3703_v60  ;;  %2826 = vmatpush3.bf16.msra.mxu1 %v3153_v9  ;;  %v2505_v41 = vsel %vm948_vm14, 1.0, %v3230_v17 }
  0xf7   :  { %2827 = vmatprep.subr.bf16.mxu1 %v3154_v25 }
  0xf8   :  { %v102_v29 = vpop.permute.xlu1 %101  ;;  %932 = vperm.xlu0 %3148, %v839_v42   ;;  %v2475_v42 = vsel %vm694_vm2, 1.0, %v3230_v17 }
  0xf9   :  { %vm178_vm0 = vcmp.eq.s32.totalorder %v3587_v13, %v102_v29  ;;  %v2473_v29 = vsel %vm692_vm10, 1.0, %v3230_v17  ;;  %vm696_vm10 = vcmp.eq.s32.totalorder %v3587_v13, %v3578_v11 }
  0xfa   :  { %3120 = vset.pattern.permute.xlu1 %v3227_v5  ;;  %v2407_v31 = vsel %vm178_vm0, 1.0, %v3230_v17  ;;  %2828 = vmatpush3.bf16.msra.mxu1 %v3154_v25 }
  0xfb   :  { %387 = vperm.xlu1 %3120, %v316_v28   ;;  %2829 = vmatprep.subr.bf16.mxu1 %v3155_v40 }
  0xfd   :  { %v358_v58 = vpop.permute.xlu1 %357 }
  0xfe   :  { %vm434_vm3 = vcmp.eq.s32.totalorder %v3587_v13, %v358_v58  ;;  %2830 = vmatpush3.bf16.msra.mxu1 %v3155_v40 }
  0xff   :  { %v2439_v39 = vsel %vm434_vm3, 1.0, %v3230_v17  ;;  %3121 = vset.pattern.permute.xlu1 %v3228_v10 }
 0x100   :  { %v530_v43 = vadd.f32 %v2439_v39, %v2407_v31  ;;  %640 = vperm.xlu1 %3121, %v571_v32   ;;  %v319_v39 = vadd.s32 10, %v3493_v35 }
 0x102   :  { %v611_v19 = vpop.permute.xlu1 %610  ;;  %v786_v48 = vadd.f32 %v2471_v45, %v530_v43 }
 0x103   :  { %vm689_vm7 = vcmp.eq.s32.totalorder %v3587_v13, %v611_v19  ;;  %v3156_v19 = vld [vmem:[%s4323_s2 + $0x28] sm:$0xff]  }
 0x104   :  { %v2470_v49 = vsel %vm689_vm7, 1.0, %v3230_v17  ;;  %3123 = vset.pattern.permute.xlu1 %v3229_v55  ;;  %v1042_v57 = vadd.f32 %v2503_v36, %v786_v48  ;;  %2831 = vmatprep.subr.bf16.mxu1 %v3156_v19  ;;  %v3157_v48 = vld [vmem:[%s4323_s2 + $0x30] sm:$0xff]   ;;  %v3158_v36 = vld [vmem:[%s4323_s2 + $0x38] sm:$0xff]  }
 0x105   :  { %v785_v16 = vadd.f32 %v2470_v49, %v529_v24  ;;  %896 = vperm.xlu1 %3123, %v827_v1   ;;  %v829_v24 = vadd.s32 60, %v3555_v63  ;;  %2832 = vmatpush3.bf16.msra.mxu1 %v3156_v19  ;;  %v320_v49 = vadd.s32 10, %v3571_v4 }
 0x106   :  { %2833 = vmatprep.subr.bf16.mxu1 %v3157_v48 }
 0x107   :  { %v105_v53 = vpop.permute.xlu1 %104  ;;  %v1041_v56 = vadd.f32 %v2502_v47, %v785_v16  ;;  %v879_v16 = vpop.permute.xlu0 %878 }
 0x108   :  { %vm179_vm12 = vcmp.eq.s32.totalorder %v3587_v13, %v105_v53  ;;  %vm949_vm5 = vcmp.eq.s32.totalorder %v3587_v13, %v879_v16 }
 0x109   :  { %899 = vperm.xlu1 %3123, %v828_v51   ;;  %2785 = vmatprep.mubr.f32.mxu0 %v1041_v56  ;;  %v2408_v30 = vsel %vm179_vm12, 1.0, %v3230_v17  ;;  %v575_v51 = vadd.s32 30, %v3493_v35  ;;  %v576_v56 = vadd.s32 30, %v3571_v4 }
 0x10a   :  { %2786 = vmatmul.mubr.f32.gmra.mrb[8].mxu0 %v1042_v57  ;;  %2834 = vmatpush3.bf16.msra.mxu1 %v3157_v48 }
 0x10b   :  { %2835 = vmatprep.subr.bf16.mxu1 %v3158_v36 }
 0x10c   :  { %v361_v61 = vpop.permute.xlu1 %360 }
 0x10d   :  { %3124 = vset.pattern.permute.xlu1 %v3227_v5  ;;  %vm435_vm9 = vcmp.eq.s32.totalorder %v3587_v13, %v361_v61 }
 0x10e   :  { %390 = vperm.xlu1 %3124, %v317_v59   ;;  %v2440_v27 = vsel %vm435_vm9, 1.0, %v3230_v17  ;;  %2836 = vmatpush3.bf16.msra.mxu1 %v3158_v36  ;;  %v882_v59 = vpop.permute.xlu0 %881  ;;  %v833_v36 = vadd.s32 60, %v3584_v12 }
 0x10f   :  { %v531_v34 = vadd.f32 %v2440_v27, %v2408_v30  ;;  %vm950_vm6 = vcmp.eq.s32.totalorder %v3587_v13, %v882_v59 }
 0x111   :  { %v108_v2 = vpop.permute.xlu1 %107 }
 0x112   :  { %3125 = vset.pattern.permute.xlu1 %v3226_v0  ;;  %vm180_vm8 = vcmp.eq.s32.totalorder %v3587_v13, %v108_v2  ;;  %v885_v30 = vpop.permute.xlu0 %884 }
 0x113   :  { %137 = vperm.xlu1 %3125, %v3486_v33   ;;  %v2409_v20 = vsel %vm180_vm8, 1.0, %v3230_v17  ;;  %v2504_v33 = vsel %vm947_vm13, 1.0, %v3230_v17  ;;  %vm951_vm13 = vcmp.eq.s32.totalorder %v3587_v13, %v885_v30 }
 0x116   :  { %v364_v14 = vpop.permute.xlu1 %363 }
 0x117   :  { %vm436_vm11 = vcmp.eq.s32.totalorder %v3587_v13, %v364_v14  ;;  %3126 = vset.pattern.permute.xlu1 %v3228_v10 }
 0x118   :  { %v2441_v21 = vsel %vm436_vm11, 1.0, %v3230_v17  ;;  %646 = vperm.xlu1 %3126, %v573_v7   ;;  %v2506_v7 = vsel %vm949_vm5, 1.0, %v3230_v17 }
 0x119   :  { %v532_v28 = vadd.f32 %v2441_v21, %v2409_v20  ;;  %v2507_v20 = vsel %vm950_vm6, 1.0, %v3230_v17 }
 0x11b   :  { %v617_v32 = vpop.permute.xlu1 %616  ;;  %v788_v58 = vadd.f32 %v2473_v29, %v532_v28  ;;  %v321_v28 = vadd.s32 10, %v3584_v12  ;;  %v577_v29 = vadd.s32 30, %v3584_v12  ;;  %v580_v12 = vadd.s32 30, %v3670_v37 }
 0x11c   :  { %vm691_vm15 = vcmp.eq.s32.totalorder %v3587_v13, %v617_v32  ;;  %649 = vperm.xlu1 %3126, %v574_v26  }
 0x11d   :  { %v2472_v31 = vsel %vm691_vm15, 1.0, %v3230_v17  ;;  %v1044_v46 = vadd.f32 %v2505_v41, %v788_v58  ;;  %v2477_v41 = vsel %vm696_vm10, 1.0, %v3230_v17 }
 0x11e   :  { %v787_v43 = vadd.f32 %v2472_v31, %v531_v34  ;;  %v578_v34 = vadd.s32 30, %v3500_v38  ;;  %v888_v31 = vpop.permute.xlu0 %887 }
 0x11f   :  { %vm952_vm14 = vcmp.eq.s32.totalorder %v3587_v13, %v888_v31 }
 0x120   :  { %3127 = vset.pattern.permute.xlu1 %v3227_v5  ;;  %v111_v45 = vpop.permute.xlu1 %110  ;;  %v1043_v1 = vadd.f32 %v2504_v33, %v787_v43  ;;  %v323_v43 = vadd.s32 10, %v3512_v44 }
 0x121   :  { %396 = vperm.xlu1 %3127, %v319_v39   ;;  %vm181_vm4 = vcmp.eq.s32.totalorder %v3587_v13, %v111_v45 }
 0x122   :  { %2788 = vmatprep.mubr.f32.mxu0 %v1043_v1  ;;  %v2410_v6 = vsel %vm181_vm4, 1.0, %v3230_v17  ;;  %v2508_v1 = vsel %vm951_vm13, 1.0, %v3230_v17  ;;  %vm698_vm4 = vcmp.eq.s32.totalorder %v3587_v13, %v3596_v15  ;;  %vm700_vm13 = vcmp.eq.s32.totalorder %v3587_v13, %v3603_v22 }
 0x123   :  { %2789 = vmatmul.mubr.f32.gmra.mrb[10].mxu0 %v1044_v46 }
 0x125   :  { %3128 = vset.pattern.permute.xlu1 %v3229_v55  ;;  %v367_v47 = vpop.permute.xlu1 %366 }
 0x126   :  { %902 = vperm.xlu1 %3128, %v829_v24   ;;  %vm437_vm1 = vcmp.eq.s32.totalorder %v3587_v13, %v367_v47  ;;  %v2509_v24 = vsel %vm952_vm14, 1.0, %v3230_v17 }
 0x127   :  { %v2442_v61 = vsel %vm437_vm1, 1.0, %v3230_v17 }
 0x128   :  { %v533_v52 = vadd.f32 %v2442_v61, %v2410_v6  ;;  %v836_v6 = vadd.s32 60, %v3670_v37 }
 0x12a   :  { %3129 = vset.pattern.permute.xlu1 %v3227_v5  ;;  %v114_v63 = vpop.permute.xlu1 %113 }
 0x12b   :  { %399 = vperm.xlu1 %3129, %v320_v49   ;;  %vm182_vm0 = vcmp.eq.s32.totalorder %v3587_v13, %v114_v63 }
 0x12c   :  { %v2411_v35 = vsel %vm182_vm0, 1.0, %v3230_v17 }
 0x12f   :  { %3130 = vset.pattern.permute.xlu1 %v3228_v10  ;;  %v370_v53 = vpop.permute.xlu1 %369 }
 0x130   :  { %vm438_vm3 = vcmp.eq.s32.totalorder %v3587_v13, %v370_v53  ;;  %652 = vperm.xlu1 %3130, %v575_v51   ;;  %v324_v51 = vadd.s32 10, %v3670_v37 }
 0x131   :  { %v2443_v57 = vsel %vm438_vm3, 1.0, %v3230_v17 }
 0x132   :  { %v534_v62 = vadd.f32 %v2443_v57, %v2411_v35  ;;  %v891_v35 = vpop.permute.xlu0 %890 }
 0x133   :  { %vm953_vm5 = vcmp.eq.s32.totalorder %v3587_v13, %v891_v35 }
 0x134   :  { %655 = vperm.xlu1 %3130, %v576_v56   ;;  %v623_v2 = vpop.permute.xlu1 %622  ;;  %v790_v9 = vadd.f32 %v2475_v42, %v534_v62  ;;  %v579_v56 = vadd.s32 30, %v3512_v44  ;;  %v2510_v15 = vsel %vm953_vm5, 1.0, %v3230_v17 }
 0x135   :  { %vm693_vm7 = vcmp.eq.s32.totalorder %v3587_v13, %v623_v2 }
 0x136   :  { %v2474_v14 = vsel %vm693_vm7, 1.0, %v3230_v17  ;;  %v1046_v27 = vadd.f32 %v2507_v20, %v790_v9  ;;  %v894_v44 = vpop.permute.xlu0 %893 }
 0x137   :  { %v789_v21 = vadd.f32 %v2474_v14, %v533_v52  ;;  %vm954_vm6 = vcmp.eq.s32.totalorder %v3587_v13, %v894_v44 }
 0x138   :  { %3131 = vset.pattern.permute.xlu1 %v3229_v55  ;;  %v2511_v20 = vsel %vm954_vm6, 1.0, %v3230_v17  ;;  %vm2140_vm6 = vcmp.ge.s32.totalorder %v3587_v13, 64 }
 0x139   :  { %911 = vperm.xlu1 %3131, %v832_v3   ;;  %v117_v23 = vpop.permute.xlu1 %116  ;;  %v1045_v26 = vadd.f32 %v2506_v7, %v789_v21  ;;  %v2479_v3 = vsel %vm698_vm4, 1.0, %v3230_v17  ;;  %v325_v21 = vadd.s32 10, %v3687_v50 }
 0x13a   :  { %vm183_vm12 = vcmp.eq.s32.totalorder %v3587_v13, %v117_v23 }
 0x13b   :  { %2791 = vmatprep.mubr.f32.mxu0 %v1045_v26 }
 0x13c   :  { %2792 = vmatmul.mubr.f32.gmra.mrb[12].mxu0 %v1046_v27 }
 0x13d   :  { %3132 = vset.pattern.permute.xlu1 %v3227_v5 }
 0x13e   :  { %402 = vperm.xlu1 %3132, %v321_v28   ;;  %v373_v4 = vpop.permute.xlu1 %372 }
 0x13f   :  { %vm439_vm9 = vcmp.eq.s32.totalorder %v3587_v13, %v373_v4  ;;  %v3880_v4 = vpop.permute.xlu0 %905 }
 0x140   :  { %v2444_v39 = vsel %vm439_vm9, 1.0, %v3230_v17 }
 0x142   :  { %3133 = vset.pattern.permute.xlu1 %v3226_v0 }
 0x143   :  { %149 = vperm.xlu1 %3133, %v3500_v38   ;;  %v120_v25 = vpop.permute.xlu1 %119  ;;  %v2412_v38 = vsel %vm183_vm12, 1.0, %v3230_v17  ;;  %v3885_v30 = vpop.permute.xlu0 %908 }
 0x144   :  { %vm184_vm8 = vcmp.eq.s32.totalorder %v3587_v13, %v120_v25  ;;  %v535_v45 = vadd.f32 %v2444_v39, %v2412_v38  ;;  %v581_v25 = vadd.s32 30, %v3687_v50 }
 0x145   :  { %v2413_v33 = vsel %vm184_vm8, 1.0, %v3230_v17 }
 0x147   :  { %3134 = vset.pattern.permute.xlu1 %v3228_v10 }
 0x148   :  { %658 = vperm.xlu1 %3134, %v577_v29   ;;  %v376_v32 = vpop.permute.xlu1 %375 }
 0x149   :  { %vm440_vm11 = vcmp.eq.s32.totalorder %v3587_v13, %v376_v32  ;;  %v582_v32 = vadd.s32 30, %v3534_v54 }
 0x14a   :  { %v2445_v58 = vsel %vm440_vm11, 1.0, %v3230_v17 }
 0x14b   :  { %v536_v40 = vadd.f32 %v2445_v58, %v2413_v33  ;;  %v3890_v33 = vpop.permute.xlu0 %917 }
 0x14c   :  { %661 = vperm.xlu1 %3134, %v578_v34  }
 0x14d   :  { %v629_v11 = vpop.permute.xlu1 %628  ;;  %v792_v46 = vadd.f32 %v2477_v41, %v536_v40  ;;  %v837_v41 = vadd.s32 60, %v3687_v50  ;;  %v328_v50 = vadd.s32 10, %v3719_v18 }
 0x14e   :  { %vm695_vm15 = vcmp.eq.s32.totalorder %v3587_v13, %v629_v11 }
 0x14f   :  { %v2476_v19 = vsel %vm695_vm15, 1.0, %v3230_v17  ;;  %v1048_v63 = vadd.f32 %v2509_v24, %v792_v46  ;;  %v3903_v11 = vpop.permute.xlu0 %920 }
 0x150   :  { %v791_v47 = vadd.f32 %v2476_v19, %v535_v45  ;;  %3135 = vset.pattern.permute.xlu1 %v3227_v5 }
 0x151   :  { %408 = vperm.xlu1 %3135, %v323_v43  }
 0x152   :  { %v123_v48 = vpop.permute.xlu1 %122  ;;  %v1047_v49 = vadd.f32 %v2508_v1, %v791_v47  ;;  %v2481_v47 = vsel %vm700_vm13, 1.0, %v3230_v17  ;;  %vm959_vm13 = vcmp.eq.s32.totalorder %v3587_v13, %v3885_v30 }
 0x153   :  { %vm185_vm3 = vcmp.eq.s32.totalorder %v3587_v13, %v123_v48 }
 0x154   :  { %2794 = vmatprep.mubr.f32.mxu0 %v1047_v49  ;;  %v2414_v2 = vsel %vm185_vm3, 1.0, %v3230_v17  ;;  %v394_v49 = vpop.permute.xlu0 %393 }
 0x155   :  { %3136 = vset.pattern.permute.xlu1 %v3229_v55  ;;  %2795 = vmatmul.mubr.f32.gmra.mrb[14].mxu0 %v1048_v63 }
 0x156   :  { %914 = vperm.xlu1 %3136, %v833_v36  }
 0x157   :  { %v379_v16 = vpop.permute.xlu1 %378 }
 0x158   :  { %vm441_vm1 = vcmp.eq.s32.totalorder %v3587_v13, %v379_v16  ;;  %v583_v16 = vadd.s32 30, %v3703_v60 }
 0x159   :  { %v2446_v62 = vsel %vm441_vm1, 1.0, %v3230_v17 }
 0x15a   :  { %3137 = vset.pattern.permute.xlu1 %v3227_v5  ;;  %v537_v7 = vadd.f32 %v2446_v62, %v2414_v2 }
 0x15b   :  { %411 = vperm.xlu1 %3137, %v324_v51  }
 0x15c   :  { %v126_v53 = vpop.permute.xlu1 %125 }
 0x15d   :  { %vm186_vm0 = vcmp.eq.s32.totalorder %v3587_v13, %v126_v53  ;;  %v3917_v53 = vpop.permute.xlu0 %405 }
 0x15e   :  { %v2415_v59 = vsel %vm186_vm0, 1.0, %v3230_v17  ;;  %vm446_vm0 = vcmp.eq.s32.totalorder %v3587_v13, %v394_v49  ;;  %v2516_v49 = vsel %vm959_vm13, 1.0, %v3230_v17 }
 0x15f   :  { %3138 = vset.pattern.permute.xlu1 %v3228_v10 }
 0x160   :  { %664 = vperm.xlu1 %3138, %v579_v56   ;;  %v584_v56 = vadd.s32 30, %v3719_v18 }
 0x161   :  { %v382_v57 = vpop.permute.xlu1 %381 }
 0x162   :  { %vm442_vm2 = vcmp.eq.s32.totalorder %v3587_v13, %v382_v57  ;;  %v840_v57 = vadd.s32 60, %v3719_v18 }
 0x163   :  { %v2447_v61 = vsel %vm442_vm2, 1.0, %v3230_v17 }
 0x164   :  { %v538_v42 = vadd.f32 %v2447_v61, %v2415_v59  ;;  %667 = vperm.xlu1 %3138, %v580_v12   ;;  %v3921_v12 = vpop.permute.xlu0 %417 }
 0x166   :  { %v635_v52 = vpop.permute.xlu1 %634  ;;  %v794_v9 = vadd.f32 %v2479_v3, %v538_v42 }
 0x167   :  { %vm697_vm7 = vcmp.eq.s32.totalorder %v3587_v13, %v635_v52 }
 0x168   :  { %v2478_v14 = vsel %vm697_vm7, 1.0, %v3230_v17  ;;  %3140 = vset.pattern.permute.xlu1 %v3229_v55  ;;  %v1050_v27 = vadd.f32 %v2511_v20, %v794_v9  ;;  %vm2141_vm7 = vcmp.lt.s32.totalorder %v3587_v13, 80 }
 0x169   :  { %v793_v37 = vadd.f32 %v2478_v14, %v537_v7  ;;  %923 = vperm.xlu1 %3140, %v836_v6  }
 0x16b   :  { %v129_v23 = vpop.permute.xlu1 %128  ;;  %v1049_v26 = vadd.f32 %v2510_v15, %v793_v37 }
 0x16c   :  { %vm187_vm9 = vcmp.eq.s32.totalorder %v3587_v13, %v129_v23 }
 0x16d   :  { %3141 = vset.pattern.permute.xlu1 %v3227_v5  ;;  %2797 = vmatprep.mubr.f32.mxu0 %v1049_v26 }
 0x16e   :  { %414 = vperm.xlu1 %3141, %v325_v21   ;;  %2798 = vmatmul.mubr.f32.gmra.mrb[16].mxu0 %v1050_v27 }
 0x170   :  { %v385_v28 = vpop.permute.xlu1 %384 }
 0x171   :  { %vm443_vm8 = vcmp.eq.s32.totalorder %v3587_v13, %v385_v28 }
 0x172   :  { %3142 = vset.pattern.permute.xlu1 %v3226_v0  ;;  %v327_v0 = vadd.s32 10, %v3703_v60  ;;  %v2448_v31 = vsel %vm443_vm8, 1.0, %v3230_v17  ;;  %v135_v60 = vpop.permute.xlu0 %134  ;;  %vm3939_vm8 = vmand %vm2140_vm6, %vm2141_vm7 }
 0x173   :  { %161 = vperm.xlu1 %3142, %v3534_v54   ;;  %v2416_v54 = vsel %vm187_vm9, 1.0, %v3230_v17  ;;  %vm189_vm3 = vcmp.eq.s32.totalorder %v3587_v13, %v135_v60  ;;  %vm958_vm9 = vcmp.eq.s32.totalorder %v3587_v13, %v3880_v4  ;;  %v3162_v60 = vld [vmem:[#allocation2 + $0x18] sm:$0xff]  }
 0x174   :  { %v539_v38 = vadd.f32 %v2448_v31, %v2416_v54  ;;  %v2418_v44 = vsel %vm189_vm3, 1.0, %v3230_v17  ;;  %vm450_vm3 = vcmp.eq.s32.totalorder %v3587_v13, %v3917_v53 }
 0x175   :  { %v132_v29 = vpop.permute.xlu1 %131 }
 0x176   :  { %vm188_vm12 = vcmp.eq.s32.totalorder %v3587_v13, %v132_v29  ;;  %v141_v26 = vpop.permute.xlu0 %140 }
 0x177   :  { %3144 = vset.pattern.permute.xlu1 %v3228_v10  ;;  %v2417_v43 = vsel %vm188_vm12, 1.0, %v3230_v17  ;;  %vm191_vm12 = vcmp.eq.s32.totalorder %v3587_v13, %v141_v26  ;;  %v3166_v26 = vld [vmem:[#allocation2 + $0x38] sm:$0xff]  }
 0x178   :  { %670 = vperm.xlu1 %3144, %v581_v25   ;;  %v2515_v25 = vsel %vm958_vm9, 1.0, %v3230_v17 }
 0x17a   :  { %v388_v34 = vpop.permute.xlu1 %387 }
 0x17b   :  { %vm444_vm10 = vcmp.eq.s32.totalorder %v3587_v13, %v388_v34 }
 0x17c   :  { %673 = vperm.xlu1 %3144, %v582_v32   ;;  %v2449_v39 = vsel %vm444_vm10, 1.0, %v3230_v17  ;;  %v3159_v32 = vld [vmem:[#allocation2] sm:$0xff]  }
 0x17d   :  { %v540_v1 = vadd.f32 %v2449_v39, %v2417_v43  ;;  %2917 = vmatprep.subr.bf16.mxu1 %v3159_v32 }
 0x17f   :  { %v641_v58 = vpop.permute.xlu1 %640  ;;  %v796_v36 = vadd.f32 %v2481_v47, %v540_v1 }
 0x180   :  { %vm699_vm11 = vcmp.eq.s32.totalorder %v3587_v13, %v641_v58  ;;  %3145 = vset.pattern.permute.xlu1 %v3227_v5 }
 0x181   :  { %420 = vperm.xlu1 %3145, %v327_v0   ;;  %v2480_v40 = vsel %vm699_vm11, 1.0, %v3230_v17 }
 0x182   :  { %v795_v46 = vadd.f32 %v2480_v40, %v539_v38  ;;  %v2420_v40 = vsel %vm191_vm12, 1.0, %v3230_v17 }
 0x184   :  { %v897_v45 = vpop.permute.xlu1 %896 }
 0x185   :  { %vm955_vm14 = vcmp.eq.s32.totalorder %v3587_v13, %v897_v45  ;;  %3146 = vset.pattern.permute.xlu1 %v3229_v55  ;;  %v3160_v45 = vld [vmem:[#allocation2 + $0x8] sm:$0xff]  }
 0x186   :  { %v2512_v19 = vsel %vm955_vm14, 1.0, %v3230_v17  ;;  %926 = vperm.xlu1 %3146, %v837_v41   ;;  %v144_v41 = vpop.permute.xlu0 %143 }
 0x187   :  { %v1051_v24 = vadd.f32 %v2512_v19, %v795_v46  ;;  %vm192_vm14 = vcmp.eq.s32.totalorder %v3587_v13, %v144_v41 }
 0x188   :  { %v900_v48 = vpop.permute.xlu1 %899 }
 0x189   :  { %vm956_vm15 = vcmp.eq.s32.totalorder %v3587_v13, %v900_v48  ;;  %2800 = vmatprep.mubr.f32.mxu0 %v1051_v24  ;;  %v3161_v48 = vld [vmem:[#allocation2 + $0x10] sm:$0xff]  }
 0x18a   :  { %v2513_v22 = vsel %vm956_vm15, 1.0, %v3230_v17  ;;  %3147 = vset.pattern.permute.xlu1 %v3227_v5 }
 0x18b   :  { %v1052_v63 = vadd.f32 %v2513_v22, %v796_v36  ;;  %423 = vperm.xlu1 %3147, %v328_v50   ;;  %v2421_v36 = vsel %vm192_vm14, 1.0, %v3230_v17  ;;  %vm963_vm14 = vcmp.eq.s32.totalorder %v3587_v13, %v3903_v11 }
 0x18c   :  { %v2520_v11 = vsel %vm963_vm14, 1.0, %v3230_v17 }
 0x18d   :  { %v391_v51 = vpop.permute.xlu1 %390  ;;  %2801 = vmatmul.mubr.f32.gmra.mrb[18].mxu0 %v1052_v63 }
 0x18e   :  { %vm445_vm2 = vcmp.eq.s32.totalorder %v3587_v13, %v391_v51 }
 0x18f   :  { %3149 = vset.pattern.permute.xlu1 %v3228_v10  ;;  %v2451_v10 = vsel %vm446_vm0, 1.0, %v3230_v17  ;;  %v2450_v61 = vsel %vm445_vm2, 1.0, %v3230_v17 }
 0x190   :  { %676 = vperm.xlu1 %3149, %v583_v16   ;;  %v541_v3 = vadd.f32 %v2450_v61, %v2418_v44 }
 0x192   :  { %v138_v35 = vpop.permute.xlu1 %137 }
 0x193   :  { %vm190_vm1 = vcmp.eq.s32.totalorder %v3587_v13, %v138_v35 }
 0x194   :  { %679 = vperm.xlu1 %3149, %v584_v56   ;;  %v2419_v18 = vsel %vm190_vm1, 1.0, %v3230_v17 }
 0x195   :  { %v542_v42 = vadd.f32 %v2451_v10, %v2419_v18 }
 0x197   :  { %v647_v5 = vpop.permute.xlu1 %646 }
 0x198   :  { %3150 = vset.pattern.permute.xlu1 %v3229_v55  ;;  %vm701_vm5 = vcmp.eq.s32.totalorder %v3587_v13, %v647_v5 }
 0x199   :  { %935 = vperm.xlu1 %3150, %v840_v57   ;;  %v2482_v6 = vsel %vm701_vm5, 1.0, %v3230_v17 }
 0x19a   :  { %v797_v21 = vadd.f32 %v2482_v6, %v541_v3 }
 0x19b   :  { %v650_v59 = vpop.permute.xlu1 %649 }
 0x19c   :  { %vm702_vm4 = vcmp.eq.s32.totalorder %v3587_v13, %v650_v59 }
 0x19d   :  { %v2483_v62 = vsel %vm702_vm4, 1.0, %v3230_v17 }
 0x19e   :  { %v798_v9 = vadd.f32 %v2483_v62, %v542_v42  ;;  %v3163_v42 = vld [vmem:[#allocation2 + $0x20] sm:$0xff]  }
 0x1a0   :  { %v397_v55 = vpop.permute.xlu1 %396  ;;  %v1054_v34 = vadd.f32 %v2515_v25, %v798_v9 }
 0x1a1   :  { %vm447_vm11 = vcmp.eq.s32.totalorder %v3587_v13, %v397_v55 }
 0x1a2   :  { %v2452_v39 = vsel %vm447_vm11, 1.0, %v3230_v17 }
 0x1a3   :  { %v2775_v2 = vpop.f32.mrb[0].mxu0  ;;  %v543_v24 = vadd.f32 %v2452_v39, %v2420_v40 }
 0x1a4   :  { %v2144_v7 = vmul.f32 %v2775_v2, %v2775_v2  ;;  %v1147_v15 = vpop.f32.mrb[1].mxu0 }
 0x1a5   :  { %v2143_v14 = vmul.f32 %v1147_v15, %v1147_v15  ;;  %v903_v20 = vpop.permute.xlu1 %902  ;;  %v1306_v37 = vpack.c.bf16 %v2775_v2, %v1147_v15 }
 0x1a6   :  { %v2176_v23 = vsel %vm3939_vm8, %v2144_v7, %v2775_v2  ;;  %vm957_vm10 = vcmp.eq.s32.totalorder %v3587_v13, %v903_v20  ;;  %v3164_v7 = vld [vmem:[#allocation2 + $0x28] sm:$0xff]  }
 0x1a7   :  { %v2175_v27 = vsel %vm3939_vm8, %v2143_v14, %v1147_v15  ;;  %v2514_v28 = vsel %vm957_vm10, 1.0, %v3230_v17  ;;  %2837 = vmatprep.mubr.bf16.mxu1 %v1306_v37  ;;  %v3165_v15 = vld [vmem:[#allocation2 + $0x30] sm:$0xff]   ;;  %vm962_vm10 = vcmp.eq.s32.totalorder %v3587_v13, %v3890_v33 }
 0x1a8   :  { %v3952_v4 = vpack.c.bf16 %v2176_v23, %v2175_v27  ;;  %v1053_v29 = vadd.f32 %v2514_v28, %v797_v21 }
 0x1aa   :  { %v400_v0 = vpop.permute.xlu1 %399  ;;  %2803 = vmatprep.mubr.f32.mxu0 %v1053_v29 }
 0x1ab   :  { %v2778_v58 = vpop.f32.mrb[2].mxu0  ;;  %2804 = vmatmul.mubr.f32.gmra.mrb[20].mxu0 %v1054_v34  ;;  %vm448_vm0 = vcmp.eq.s32.totalorder %v3587_v13, %v400_v0  ;;  %v2455_v0 = vsel %vm450_vm3, 1.0, %v3230_v17 }
 0x1ac   :  { %v2146_v31 = vmul.f32 %v2778_v58, %v2778_v58  ;;  %v1157_v54 = vpop.f32.mrb[3].mxu0  ;;  %v2453_v16 = vsel %vm448_vm0, 1.0, %v3230_v17 }
 0x1ad   :  { %v1307_v38 = vpack.c.bf16 %v2778_v58, %v1157_v54  ;;  %v2145_v43 = vmul.f32 %v1157_v54, %v1157_v54  ;;  %v544_v18 = vadd.f32 %v2453_v16, %v2421_v36 }
 0x1ae   :  { %v2178_v1 = vsel %vm3939_vm8, %v2146_v31, %v2778_v58 }
 0x1af   :  { %v2177_v46 = vsel %vm3939_vm8, %v2145_v43, %v1157_v54  ;;  %v653_v19 = vpop.permute.xlu1 %652  ;;  %2838 = vmatmul.mubr.bf16.vlgmr.msra.gmra.mrb[0].mxu1 %v1307_v38 }
 0x1b0   :  { %v3965_v50 = vpack.c.bf16 %v2178_v1, %v2177_v46  ;;  %vm703_vm15 = vcmp.eq.s32.totalorder %v3587_v13, %v653_v19  ;;  %2918 = vmatpush3.bf16.msra.mxu1 %v3159_v32  ;;  %v147_v32 = vpop.permute.xlu0 %146 }
 0x1b1   :  { %v2484_v47 = vsel %vm703_vm15, 1.0, %v3230_v17  ;;  %2919 = vmatprep.subr.bf16.mxu1 %v3160_v45  ;;  %vm193_vm6 = vcmp.eq.s32.totalorder %v3587_v13, %v147_v32 }
 0x1b2   :  { %v799_v30 = vadd.f32 %v2484_v47, %v543_v24  ;;  %v2422_v53 = vsel %vm193_vm6, 1.0, %v3230_v17  ;;  %v2519_v24 = vsel %vm962_vm10, 1.0, %v3230_v17 }
 0x1b3   :  { %v656_v22 = vpop.permute.xlu1 %655  ;;  %v2781_v63 = vpop.f32.mrb[4].mxu0 }
 0x1b4   :  { %vm704_vm1 = vcmp.eq.s32.totalorder %v3587_v13, %v656_v22  ;;  %v2148_v51 = vmul.f32 %v2781_v63, %v2781_v63  ;;  %v1167_v56 = vpop.f32.mrb[5].mxu0  ;;  %v1055_v35 = vadd.f32 %v2516_v49, %v799_v30  ;;  %2920 = vmatpush3.bf16.msra.mxu1 %v3160_v45  ;;  %v153_v46 = vpop.permute.xlu0 %152 }
 0x1b5   :  { %v1308_v57 = vpack.c.bf16 %v2781_v63, %v1167_v56  ;;  %v2147_v5 = vmul.f32 %v1167_v56, %v1167_v56  ;;  %2921 = vmatprep.subr.bf16.mxu1 %v3161_v48  ;;  %v2485_v59 = vsel %vm704_vm1, 1.0, %v3230_v17  ;;  %vm195_vm13 = vcmp.eq.s32.totalorder %v3587_v13, %v153_v46 }
 0x1b6   :  { %v2180_v10 = vsel %vm3939_vm8, %v2148_v51, %v2781_v63  ;;  %2806 = vmatprep.mubr.f32.mxu0 %v1055_v35  ;;  %v800_v62 = vadd.f32 %v2485_v59, %v544_v18  ;;  %v2424_v49 = vsel %vm195_vm13, 1.0, %v3230_v17 }
 0x1b7   :  { %v2179_v55 = vsel %vm3939_vm8, %v2147_v5, %v1167_v56  ;;  %2841 = vmatprep.mubr.bf16.mxu1 %v1308_v57 }
 0x1b8   :  { %v3979_v61 = vpack.c.bf16 %v2180_v10, %v2179_v55  ;;  %v912_v44 = vpop.permute.xlu1 %911  ;;  %2922 = vmatpush3.bf16.msra.mxu1 %v3161_v48  ;;  %v156_v22 = vpop.permute.xlu0 %155 }
 0x1b9   :  { %vm960_vm2 = vcmp.eq.s32.totalorder %v3587_v13, %v912_v44  ;;  %2923 = vmatprep.subr.bf16.mxu1 %v3162_v60  ;;  %vm196_vm1 = vcmp.eq.s32.totalorder %v3587_v13, %v156_v22 }
 0x1ba   :  { %v2517_v6 = vsel %vm960_vm2, 1.0, %v3230_v17 }
 0x1bb   :  { %v1056_v2 = vadd.f32 %v2517_v6, %v800_v62  ;;  %v2425_v62 = vsel %vm196_vm1, 1.0, %v3230_v17  ;;  %v3167_v6 = vld [vmem:[%s4324_s3] sm:$0xff]  }
 0x1bc   :  { %2924 = vmatpush3.bf16.msra.mxu1 %v3162_v60  ;;  %2869 = vmatprep.subr.bf16.mxu0 %v3167_v6 }
 0x1bd   :  { %v403_v3 = vpop.permute.xlu1 %402  ;;  %2807 = vmatmul.mubr.f32.gmra.mrb[22].mxu0 %v1056_v2  ;;  %2925 = vmatprep.subr.bf16.mxu1 %v3163_v42  ;;  %v3168_v2 = vld [vmem:[%s4324_s3 + $0x8] sm:$0xff]  }
 0x1be   :  { %vm449_vm5 = vcmp.eq.s32.totalorder %v3587_v13, %v403_v3  ;;  %2870 = vmatpush3.bf16.msra.mxu0 %v3167_v6 }
 0x1bf   :  { %v2454_v54 = vsel %vm449_vm5, 1.0, %v3230_v17  ;;  %2871 = vmatprep.subr.bf16.mxu0 %v3168_v2 }
 0x1c0   :  { %2926 = vmatpush3.bf16.msra.mxu1 %v3163_v42  ;;  %v545_v38 = vadd.f32 %v2454_v54, %v2422_v53 }
 0x1c1   :  { %2927 = vmatprep.subr.bf16.mxu1 %v3164_v7 }
 0x1c2   :  { %v150_v9 = vpop.permute.xlu1 %149  ;;  %2872 = vmatpush3.bf16.msra.mxu0 %v3168_v2 }
 0x1c3   :  { %vm194_vm4 = vcmp.eq.s32.totalorder %v3587_v13, %v150_v9  ;;  %v3169_v9 = vld [vmem:[%s4324_s3 + $0x10] sm:$0xff]  }
 0x1c4   :  { %v2784_v14 = vpop.f32.mrb[6].mxu0  ;;  %2928 = vmatpush3.bf16.msra.mxu1 %v3164_v7  ;;  %v2423_v58 = vsel %vm194_vm4, 1.0, %v3230_v17  ;;  %2873 = vmatprep.subr.bf16.mxu0 %v3169_v9 }
 0x1c5   :  { %v2150_v20 = vmul.f32 %v2784_v14, %v2784_v14  ;;  %v1177_v37 = vpop.f32.mrb[7].mxu0  ;;  %2929 = vmatprep.subr.bf16.mxu1 %v3165_v15  ;;  %v546_v40 = vadd.f32 %v2455_v0, %v2423_v58 }
 0x1c6   :  { %v1309_v21 = vpack.c.bf16 %v2784_v14, %v1177_v37  ;;  %v2149_v23 = vmul.f32 %v1177_v37, %v1177_v37  ;;  %2874 = vmatpush3.bf16.msra.mxu0 %v3169_v9 }
 0x1c7   :  { %v2182_v27 = vsel %vm3939_vm8, %v2150_v20, %v2784_v14  ;;  %v659_v28 = vpop.permute.xlu1 %658 }
 0x1c8   :  { %v2181_v25 = vsel %vm3939_vm8, %v2149_v23, %v1177_v37  ;;  %2842 = vmatmul.mubr.bf16.gmra.mrb[4].mxu1 %v1309_v21  ;;  %vm705_vm9 = vcmp.eq.s32.totalorder %v3587_v13, %v659_v28  ;;  %v3170_v21 = vld [vmem:[%s4324_s3 + $0x18] sm:$0xff]  }
 0x1c9   :  { %v3987_v29 = vpack.c.bf16 %v2182_v27, %v2181_v25  ;;  %2930 = vmatpush3.bf16.msra.mxu1 %v3165_v15  ;;  %v2486_v41 = vsel %vm705_vm9, 1.0, %v3230_v17  ;;  %2875 = vmatprep.subr.bf16.mxu0 %v3170_v21  ;;  %v3171_v27 = vld [vmem:[%s4324_s3 + $0x20] sm:$0xff]  }
 0x1ca   :  { %2931 = vmatprep.subr.bf16.mxu1 %v3166_v26  ;;  %v801_v1 = vadd.f32 %v2486_v41, %v545_v38  ;;  %2876 = vmatpush3.bf16.msra.mxu0 %v3170_v21 }
 0x1cb   :  { %v662_v34 = vpop.permute.xlu1 %661  ;;  %2877 = vmatprep.subr.bf16.mxu0 %v3171_v27 }
 0x1cc   :  { %vm706_vm7 = vcmp.eq.s32.totalorder %v3587_v13, %v662_v34 }
 0x1cd   :  { %2932 = vmatpush3.bf16.msra.mxu1 %v3166_v26  ;;  %v2487_v39 = vsel %vm706_vm7, 1.0, %v3230_v17  ;;  %v159_v26 = vpop.permute.xlu0 %158  ;;  %vm454_vm7 = vcmp.eq.s32.totalorder %v3587_v13, %v3921_v12 }
 0x1ce   :  { %v802_v43 = vadd.f32 %v2487_v39, %v546_v40  ;;  %2878 = vmatpush3.bf16.msra.mxu0 %v3171_v27  ;;  %vm197_vm5 = vcmp.eq.s32.totalorder %v3587_v13, %v159_v26 }
 0x1d0   :  { %v409_v31 = vpop.permute.xlu1 %408  ;;  %v1058_v48 = vadd.f32 %v2519_v24, %v802_v43  ;;  %v3172_v43 = vld [vmem:[%s4324_s3 + $0x28] sm:$0xff]  }
 0x1d1   :  { %vm451_vm12 = vcmp.eq.s32.totalorder %v3587_v13, %v409_v31  ;;  %v165_v25 = vpop.permute.xlu0 %164  ;;  %2879 = vmatprep.subr.bf16.mxu0 %v3172_v43 }
 0x1d2   :  { %v2456_v33 = vsel %vm451_vm12, 1.0, %v3230_v17  ;;  %2880 = vmatpush3.bf16.msra.mxu0 %v3172_v43  ;;  %vm199_vm14 = vcmp.eq.s32.totalorder %v3587_v13, %v165_v25 }
 0x1d3   :  { %v547_v57 = vadd.f32 %v2456_v33, %v2424_v49  ;;  %v3173_v33 = vld [vmem:[%s4324_s3 + $0x30] sm:$0xff]  }
 0x1d4   :  { %2881 = vmatprep.subr.bf16.mxu0 %v3173_v33 }
 0x1d5   :  { %v915_v45 = vpop.permute.xlu1 %914  ;;  %v4051_v38 = vpop.permute.xlu0 %167 }
 0x1d6   :  { %vm961_vm11 = vcmp.eq.s32.totalorder %v3587_v13, %v915_v45  ;;  %2882 = vmatpush3.bf16.msra.mxu0 %v3173_v33 }
 0x1d7   :  { %v2518_v19 = vsel %vm961_vm11, 1.0, %v3230_v17 }
 0x1d8   :  { %v1057_v47 = vadd.f32 %v2518_v19, %v801_v1  ;;  %v2426_v19 = vsel %vm197_vm5, 1.0, %v3230_v17 }
 0x1d9   :  { %v930_v1 = vpop.permute.xlu0 %929 }
 0x1da   :  { %v412_v30 = vpop.permute.xlu1 %411  ;;  %2809 = vmatprep.mubr.f32.mxu0 %v1057_v47  ;;  %v2459_v47 = vsel %vm454_vm7, 1.0, %v3230_v17  ;;  %vm966_vm11 = vcmp.eq.s32.totalorder %v3587_v13, %v930_v1 }
 0x1db   :  { %2810 = vmatmul.mubr.f32.gmra.mrb[24].mxu0 %v1058_v48  ;;  %vm452_vm0 = vcmp.eq.s32.totalorder %v3587_v13, %v412_v30 }
 0x1dc   :  { %v2457_v44 = vsel %vm452_vm0, 1.0, %v3230_v17 }
 0x1dd   :  { %v2787_v36 = vpop.f32.mrb[8].mxu0  ;;  %v548_v7 = vadd.f32 %v2457_v44, %v2425_v62 }
 0x1de   :  { %v2152_v63 = vmul.f32 %v2787_v36, %v2787_v36  ;;  %v1187_v16 = vpop.f32.mrb[9].mxu0 }
 0x1df   :  { %v1310_v51 = vpack.c.bf16 %v2787_v36, %v1187_v16  ;;  %v2151_v56 = vmul.f32 %v1187_v16, %v1187_v16  ;;  %v665_v35 = vpop.permute.xlu1 %664 }
 0x1e0   :  { %v2184_v5 = vsel %vm3939_vm8, %v2152_v63, %v2787_v36  ;;  %vm707_vm15 = vcmp.eq.s32.totalorder %v3587_v13, %v665_v35 }
 0x1e1   :  { %v2183_v60 = vsel %vm3939_vm8, %v2151_v56, %v1187_v16  ;;  %v2488_v59 = vsel %vm707_vm15, 1.0, %v3230_v17  ;;  %2845 = vmatprep.mubr.bf16.mxu1 %v1310_v51  ;;  %v2523_v16 = vsel %vm966_vm11, 1.0, %v3230_v17  ;;  %v3174_v56 = vld [vmem:[%s4324_s3 + $0x38] sm:$0xff]  }
 0x1e2   :  { %v4021_v10 = vpack.c.bf16 %v2184_v5, %v2183_v60  ;;  %v803_v18 = vadd.f32 %v2488_v59, %v547_v57  ;;  %2883 = vmatprep.subr.bf16.mxu0 %v3174_v56  ;;  %v933_v60 = vpop.permute.xlu0 %932 }
 0x1e3   :  { %v668_v55 = vpop.permute.xlu1 %667  ;;  %2884 = vmatpush3.bf16.msra.mxu0 %v3174_v56  ;;  %vm967_vm15 = vcmp.eq.s32.totalorder %v3587_v13, %v933_v60 }
 0x1e4   :  { %vm708_vm2 = vcmp.eq.s32.totalorder %v3587_v13, %v668_v55  ;;  %v1059_v42 = vadd.f32 %v2520_v11, %v803_v18  ;;  %v2428_v18 = vsel %vm199_vm14, 1.0, %v3230_v17  ;;  %v2524_v6 = vsel %vm967_vm15, 1.0, %v3230_v17 }
 0x1e5   :  { %v2489_v3 = vsel %vm708_vm2, 1.0, %v3230_v17  ;;  %vm200_vm2 = vcmp.eq.s32.totalorder %v3587_v13, %v4051_v38 }
 0x1e6   :  { %2812 = vmatprep.mubr.f32.mxu0 %v1059_v42  ;;  %v804_v14 = vadd.f32 %v2489_v3, %v548_v7  ;;  %v2429_v26 = vsel %vm200_vm2, 1.0, %v3230_v17 }
 0x1e8   :  { %v924_v15 = vpop.permute.xlu1 %923 }
 0x1e9   :  { %vm964_vm3 = vcmp.eq.s32.totalorder %v3587_v13, %v924_v15 }
 0x1ea   :  { %v2521_v20 = vsel %vm964_vm3, 1.0, %v3230_v17 }
 0x1eb   :  { %v1060_v37 = vadd.f32 %v2521_v20, %v804_v14 }
 0x1ed   :  { %v415_v23 = vpop.permute.xlu1 %414  ;;  %2813 = vmatmul.mubr.f32.gmra.mrb[26].mxu0 %v1060_v37 }
 0x1ee   :  { %vm453_vm6 = vcmp.eq.s32.totalorder %v3587_v13, %v415_v23 }
 0x1ef   :  { %v2458_v24 = vsel %vm453_vm6, 1.0, %v3230_v17 }
 0x1f0   :  { %v549_v49 = vadd.f32 %v2458_v24, %v2426_v19 }
 0x1f2   :  { %v162_v28 = vpop.permute.xlu1 %161 }
 0x1f3   :  { %vm198_vm4 = vcmp.eq.s32.totalorder %v3587_v13, %v162_v28 }
 0x1f4   :  { %v2427_v45 = vsel %vm198_vm4, 1.0, %v3230_v17 }
 0x1f5   :  { %v550_v48 = vadd.f32 %v2459_v47, %v2427_v45 }
 0x1f6   :  { %v2790_v32 = vpop.f32.mrb[10].mxu0 }
 0x1f7   :  { %v2154_v34 = vmul.f32 %v2790_v32, %v2790_v32  ;;  %v671_v0 = vpop.permute.xlu1 %670  ;;  %v1197_v58 = vpop.f32.mrb[11].mxu0 }
 0x1f8   :  { %v1311_v31 = vpack.c.bf16 %v2790_v32, %v1197_v58  ;;  %v2153_v54 = vmul.f32 %v1197_v58, %v1197_v58  ;;  %vm709_vm10 = vcmp.eq.s32.totalorder %v3587_v13, %v671_v0 }
 0x1f9   :  { %v2186_v53 = vsel %vm3939_vm8, %v2154_v34, %v2790_v32  ;;  %v2490_v30 = vsel %vm709_vm10, 1.0, %v3230_v17 }
 0x1fa   :  { %v2185_v39 = vsel %vm3939_vm8, %v2153_v54, %v1197_v58  ;;  %2846 = vmatmul.mubr.bf16.gmra.mrb[8].mxu1 %v1311_v31  ;;  %v805_v63 = vadd.f32 %v2490_v30, %v549_v49 }
 0x1fb   :  { %v4049_v40 = vpack.c.bf16 %v2186_v53, %v2185_v39  ;;  %v674_v41 = vpop.permute.xlu1 %673 }
 0x1fc   :  { %vm710_vm9 = vcmp.eq.s32.totalorder %v3587_v13, %v674_v41 }
 0x1fd   :  { %v2491_v12 = vsel %vm710_vm9, 1.0, %v3230_v17 }
 0x1fe   :  { %v806_v36 = vadd.f32 %v2491_v12, %v550_v48 }
 0x200   :  { %v421_v46 = vpop.permute.xlu1 %420  ;;  %v1062_v57 = vadd.f32 %v2523_v16, %v806_v36 }
 0x201   :  { %vm455_vm13 = vcmp.eq.s32.totalorder %v3587_v13, %v421_v46 }
 0x202   :  { %v2460_v59 = vsel %vm455_vm13, 1.0, %v3230_v17 }
 0x203   :  { %v551_v44 = vadd.f32 %v2460_v59, %v2428_v18 }
 0x205   :  { %v927_v22 = vpop.permute.xlu1 %926 }
 0x206   :  { %vm965_vm12 = vcmp.eq.s32.totalorder %v3587_v13, %v927_v22 }
 0x207   :  { %v2522_v51 = vsel %vm965_vm12, 1.0, %v3230_v17 }
 0x208   :  { %v1061_v35 = vadd.f32 %v2522_v51, %v805_v63 }
 0x20a   :  { %v424_v5 = vpop.permute.xlu1 %423  ;;  %2815 = vmatprep.mubr.f32.mxu0 %v1061_v35 }
 0x20b   :  { %2816 = vmatmul.mubr.f32.gmra.mrb[28].mxu0 %v1062_v57  ;;  %vm456_vm1 = vcmp.eq.s32.totalorder %v3587_v13, %v424_v5  ;;  %v4121_v5 = vld [vmem:[%s4326_s5] ss:$0 sm:$0xff] }
 0x20c   :  { %v2461_v37 = vsel %vm456_vm1, 1.0, %v3230_v17 }
 0x20d   :  { %v552_v28 = vadd.f32 %v2461_v37, %v2429_v26 }
 0x20f   :  { %v677_v11 = vpop.permute.xlu1 %676  ;;  %v2793_v55 = vpop.f32.mrb[12].mxu0 }
 0x210   :  { %vm711_vm0 = vcmp.eq.s32.totalorder %v3587_v13, %v677_v11  ;;  %v2156_v62 = vmul.f32 %v2793_v55, %v2793_v55  ;;  %v1207_v42 = vpop.f32.mrb[13].mxu0 }
 0x211   :  { %v2492_v2 = vsel %vm711_vm0, 1.0, %v3230_v17  ;;  %v1312_v3 = vpack.c.bf16 %v2793_v55, %v1207_v42  ;;  %v2155_v7 = vmul.f32 %v1207_v42, %v1207_v42 }
 0x212   :  { %v807_v15 = vadd.f32 %v2492_v2, %v551_v44  ;;  %v2188_v9 = vsel %vm3939_vm8, %v2156_v62, %v2793_v55 }
 0x213   :  { %v2187_v14 = vsel %vm3939_vm8, %v2155_v7, %v1207_v42  ;;  %v680_v20 = vpop.permute.xlu1 %679  ;;  %2849 = vmatprep.mubr.bf16.mxu1 %v1312_v3 }
 0x214   :  { %v4095_v21 = vpack.c.bf16 %v2188_v9, %v2187_v14  ;;  %v1063_v23 = vadd.f32 %v2524_v6, %v807_v15  ;;  %vm712_vm3 = vcmp.eq.s32.totalorder %v3587_v13, %v680_v20 }
 0x215   :  { %v2493_v27 = vsel %vm712_vm3, 1.0, %v3230_v17 }
 0x216   :  { %2818 = vmatprep.mubr.f32.mxu0 %v1063_v23  ;;  %v808_v32 = vadd.f32 %v2493_v27, %v552_v28 }
 0x218   :  { %v936_v25 = vpop.permute.xlu1 %935 }
 0x219   :  { %vm968_vm4 = vcmp.eq.s32.totalorder %v3587_v13, %v936_v25 }
 0x21a   :  { %v2525_v34 = vsel %vm968_vm4, 1.0, %v3230_v17 }
 0x21b   :  { %v1064_v0 = vadd.f32 %v2525_v34, %v808_v32 }
 0x21d   :  { %2819 = vmatmul.mubr.f32.gmra.mrb[30].mxu0 %v1064_v0 }
 0x228   :  { %v2796_v58 = vpop.f32.mrb[14].mxu0 }
 0x229   :  { %v2158_v31 = vmul.f32 %v2796_v58, %v2796_v58  ;;  %v1217_v54 = vpop.f32.mrb[15].mxu0 }
 0x22a   :  { %v1313_v53 = vpack.c.bf16 %v2796_v58, %v1217_v54  ;;  %v2157_v39 = vmul.f32 %v1217_v54, %v1217_v54 }
 0x22b   :  { %v2190_v41 = vsel %vm3939_vm8, %v2158_v31, %v2796_v58 }
 0x22c   :  { %v2189_v38 = vsel %vm3939_vm8, %v2157_v39, %v1217_v54  ;;  %2850 = vmatmul.mubr.bf16.gmra.mrb[12].mxu1 %v1313_v53 }
 0x22d   :  { %v4106_v43 = vpack.c.bf16 %v2190_v41, %v2189_v38 }
 0x241   :  { %v2799_v45 = vpop.f32.mrb[16].mxu0 }
 0x242   :  { %v2160_v13 = vmul.f32 %v2799_v45, %v2799_v45  ;;  %v1227_v1 = vpop.f32.mrb[17].mxu0 }
 0x243   :  { %v1314_v17 = vpack.c.bf16 %v2799_v45, %v1227_v1  ;;  %v2159_v46 = vmul.f32 %v1227_v1, %v1227_v1 }
 0x244   :  { %v2192_v19 = vsel %vm3939_vm8, %v2160_v13, %v2799_v45 }
 0x245   :  { %v2191_v24 = vsel %vm3939_vm8, %v2159_v46, %v1227_v1  ;;  %2853 = vmatprep.mubr.bf16.mxu1 %v1314_v17 }
 0x246   :  { %v3029_v47 = vpack.c.bf16 %v2192_v19, %v2191_v24 }
 0x248   :  { %3030 = vmatprep.subr.bf16.mxu1 %v3029_v47 }
 0x260   :  { %v2802_v12 = vpop.f32.mrb[18].mxu0 }
 0x261   :  { %v2162_v48 = vmul.f32 %v2802_v12, %v2802_v12  ;;  %v1237_v30 = vpop.f32.mrb[19].mxu0 }
 0x262   :  { %v1315_v33 = vpack.c.bf16 %v2802_v12, %v1237_v30  ;;  %v2161_v49 = vmul.f32 %v1237_v30, %v1237_v30 }
 0x263   :  { %v2194_v36 = vsel %vm3939_vm8, %v2162_v48, %v2802_v12 }
 0x264   :  { %v2193_v22 = vsel %vm3939_vm8, %v2161_v49, %v1237_v30  ;;  %2854 = vmatmul.mubr.bf16.gmra.mrb[16].mxu1 %v1315_v33 }
 0x265   :  { %v4116_v63 = vpack.c.bf16 %v2194_v36, %v2193_v22 }
 0x27e   :  { %v2805_v16 = vpop.f32.mrb[20].mxu0 }
 0x27f   :  { %v2164_v51 = vmul.f32 %v2805_v16, %v2805_v16  ;;  %v1247_v56 = vpop.f32.mrb[21].mxu0 }
 0x280   :  { %v1316_v35 = vpack.c.bf16 %v2805_v16, %v1247_v56  ;;  %v2163_v57 = vmul.f32 %v1247_v56, %v1247_v56 }
 0x281   :  { %v2196_v60 = vsel %vm3939_vm8, %v2164_v51, %v2805_v16 }
 0x282   :  { %v2195_v59 = vsel %vm3939_vm8, %v2163_v57, %v1247_v56  ;;  %v2839_v18 = vpop.f32.mrb[0].mxu1  ;;  %2857 = vmatprep.mubr.bf16.mxu1 %v1316_v35 }
 0x283   :  { %v1434_v11 = vadd.f32 %v2839_v18, %v4121_v5  ;;  %v1425_v55 = vpop.f32.mrb[1].mxu1  ;;  %v4128_v44 = vpack.c.bf16 %v2196_v60, %v2195_v59 }
 0x284   :  { %v1426_v62 = vadd.f32 %v4121_v5, %v1425_v55  ;;  %v2840_v42 = vpop.f32.mrb[2].mxu1 }
 0x285   :  { %v1437_v6 = vadd.f32 %v2840_v42, %v4121_v5  ;;  %v1428_v2 = vpop.f32.mrb[3].mxu1  ;;  %v1554_v7 = vmax.f32 %v1434_v11, 0.0 }
 0x286   :  { %v1429_v3 = vadd.f32 %v4121_v5, %v1428_v2  ;;  %v1552_v9 = vmax.f32 %v1426_v62, 0.0 }
 0x287   :  { %v1555_v15 = vmax.f32 %v1437_v6, 0.0 }
 0x288   :  { %v1553_v14 = vmax.f32 %v1429_v3, 0.0 }
 0x289   :  { %v1585_v20 = vpack.c.bf16 %v1555_v15, %v1554_v7 }
 0x28a   :  { %v1584_v37 = vpack.c.bf16 %v1553_v14, %v1552_v9 }
 0x28c   :  { %2885 = vmatprep.mubr.bf16.mxu0 %v1584_v37 }
 0x28d   :  { %2886 = vmatmul.mubr.bf16.vlgmr.msra.gmra.mrb[32].mxu0 %v1585_v20 }
 0x290   :  { %v2808_v23 = vpop.f32.mrb[22].mxu0 }
 0x291   :  { %v2166_v26 = vmul.f32 %v2808_v23, %v2808_v23  ;;  %v1257_v27 = vpop.f32.mrb[23].mxu0 }
 0x292   :  { %v1317_v28 = vpack.c.bf16 %v2808_v23, %v1257_v27  ;;  %v2165_v25 = vmul.f32 %v1257_v27, %v1257_v27 }
 0x293   :  { %v2198_v32 = vsel %vm3939_vm8, %v2166_v26, %v2808_v23 }
 0x294   :  { %v2197_v34 = vsel %vm3939_vm8, %v2165_v25, %v1257_v27  ;;  %2858 = vmatmul.mubr.bf16.gmra.mrb[20].mxu1 %v1317_v28 }
 0x295   :  { %v4137_v0 = vpack.c.bf16 %v2198_v32, %v2197_v34 }
 0x29b   :  { %v2843_v58 = vpop.f32.mrb[4].mxu1 }
 0x29c   :  { %v1450_v31 = vadd.f32 %v2843_v58, %v4121_v5  ;;  %v1441_v54 = vpop.f32.mrb[5].mxu1 }
 0x29d   :  { %v1442_v53 = vadd.f32 %v4121_v5, %v1441_v54  ;;  %v2844_v39 = vpop.f32.mrb[6].mxu1 }
 0x29e   :  { %v1453_v41 = vadd.f32 %v2844_v39, %v4121_v5  ;;  %v1444_v38 = vpop.f32.mrb[7].mxu1  ;;  %v1558_v13 = vmax.f32 %v1450_v31, 0.0 }
 0x29f   :  { %v1445_v45 = vadd.f32 %v4121_v5, %v1444_v38  ;;  %v1556_v17 = vmax.f32 %v1442_v53, 0.0 }
 0x2a0   :  { %v1559_v1 = vmax.f32 %v1453_v41, 0.0 }
 0x2a1   :  { %v1557_v46 = vmax.f32 %v1445_v45, 0.0 }
 0x2a2   :  { %v1587_v19 = vpack.c.bf16 %v1559_v1, %v1558_v13 }
 0x2a3   :  { %v1586_v24 = vpack.c.bf16 %v1557_v46, %v1556_v17 }
 0x2a5   :  { %2889 = vmatprep.mubr.bf16.mxu0 %v1586_v24 }
 0x2a6   :  { %2890 = vmatmul.mubr.bf16.gmra.mrb[36].mxu0 %v1587_v19 }
 0x2ae   :  { %v2811_v47 = vpop.f32.mrb[24].mxu0 }
 0x2af   :  { %v2168_v12 = vmul.f32 %v2811_v47, %v2811_v47  ;;  %v1267_v48 = vpop.f32.mrb[25].mxu0 }
 0x2b0   :  { %v1318_v30 = vpack.c.bf16 %v2811_v47, %v1267_v48  ;;  %v2167_v33 = vmul.f32 %v1267_v48, %v1267_v48 }
 0x2b1   :  { %v2200_v49 = vsel %vm3939_vm8, %v2168_v12, %v2811_v47 }
 0x2b2   :  { %v2199_v36 = vsel %vm3939_vm8, %v2167_v33, %v1267_v48  ;;  %2861 = vmatprep.mubr.bf16.mxu1 %v1318_v30 }
 0x2b3   :  { %v4147_v22 = vpack.c.bf16 %v2200_v49, %v2199_v36 }
 0x2c0   :  { %v2814_v16 = vpop.f32.mrb[26].mxu0 }
 0x2c1   :  { %v2170_v51 = vmul.f32 %v2814_v16, %v2814_v16  ;;  %v1277_v56 = vpop.f32.mrb[27].mxu0 }
 0x2c2   :  { %v1319_v35 = vpack.c.bf16 %v2814_v16, %v1277_v56  ;;  %v2169_v57 = vmul.f32 %v1277_v56, %v1277_v56 }
 0x2c3   :  { %v2202_v60 = vsel %vm3939_vm8, %v2170_v51, %v2814_v16 }
 0x2c4   :  { %v2201_v59 = vsel %vm3939_vm8, %v2169_v57, %v1277_v56  ;;  %2862 = vmatmul.mubr.bf16.gmra.mrb[24].mxu1 %v1319_v35 }
 0x2c5   :  { %v4153_v18 = vpack.c.bf16 %v2202_v60, %v2201_v59 }
 0x2cd   :  { %v2847_v11 = vpop.f32.mrb[8].mxu1 }
 0x2ce   :  { %v1466_v55 = vadd.f32 %v2847_v11, %v4121_v5  ;;  %v1457_v62 = vpop.f32.mrb[9].mxu1 }
 0x2cf   :  { %v1458_v42 = vadd.f32 %v4121_v5, %v1457_v62  ;;  %v2848_v6 = vpop.f32.mrb[10].mxu1 }
 0x2d0   :  { %v1469_v2 = vadd.f32 %v2848_v6, %v4121_v5  ;;  %v1460_v3 = vpop.f32.mrb[11].mxu1  ;;  %v1562_v15 = vmax.f32 %v1466_v55, 0.0 }
 0x2d1   :  { %v1461_v7 = vadd.f32 %v4121_v5, %v1460_v3  ;;  %v1560_v14 = vmax.f32 %v1458_v42, 0.0 }
 0x2d2   :  { %v1563_v9 = vmax.f32 %v1469_v2, 0.0 }
 0x2d3   :  { %v1561_v20 = vmax.f32 %v1461_v7, 0.0 }
 0x2d4   :  { %v1589_v37 = vpack.c.bf16 %v1563_v9, %v1562_v15  ;;  %v4182_v9 = vld [vmem:[%s4326_s5 + $0x1] ss:$0 sm:$0xff] }
 0x2d5   :  { %v1588_v23 = vpack.c.bf16 %v1561_v20, %v1560_v14 }
 0x2d7   :  { %2893 = vmatprep.mubr.bf16.mxu0 %v1588_v23 }
 0x2d8   :  { %2894 = vmatmul.mubr.bf16.gmra.mrb[40].mxu0 %v1589_v37 }
 0x2de   :  { %v2817_v26 = vpop.f32.mrb[28].mxu0 }
 0x2df   :  { %v2172_v27 = vmul.f32 %v2817_v26, %v2817_v26  ;;  %v1287_v28 = vpop.f32.mrb[29].mxu0 }
 0x2e0   :  { %v1320_v25 = vpack.c.bf16 %v2817_v26, %v1287_v28  ;;  %v2171_v32 = vmul.f32 %v1287_v28, %v1287_v28 }
 0x2e1   :  { %v2204_v34 = vsel %vm3939_vm8, %v2172_v27, %v2817_v26 }
 0x2e2   :  { %v2203_v58 = vsel %vm3939_vm8, %v2171_v32, %v1287_v28  ;;  %2865 = vmatprep.mubr.bf16.mxu1 %v1320_v25 }
 0x2e3   :  { %v4163_v31 = vpack.c.bf16 %v2204_v34, %v2203_v58 }
 0x2f0   :  { %v2820_v54 = vpop.f32.mrb[30].mxu0 }
 0x2f1   :  { %v2174_v53 = vmul.f32 %v2820_v54, %v2820_v54  ;;  %v1297_v39 = vpop.f32.mrb[31].mxu0 }
 0x2f2   :  { %v1321_v41 = vpack.c.bf16 %v2820_v54, %v1297_v39  ;;  %v2173_v38 = vmul.f32 %v1297_v39, %v1297_v39 }
 0x2f3   :  { %v2206_v45 = vsel %vm3939_vm8, %v2174_v53, %v2820_v54 }
 0x2f4   :  { %v2205_v13 = vsel %vm3939_vm8, %v2173_v38, %v1297_v39  ;;  %2866 = vmatmul.mubr.bf16.gmra.mrb[28].mxu1 %v1321_v41  ;;  %vm2380_vm8 = vcmp.lt.s32.totalorder %v71_v8, 256 }
 0x2f5   :  { %v4169_v1 = vpack.c.bf16 %v2206_v45, %v2205_v13 }
 0x2ff   :  { %v2851_v17 = vpop.f32.mrb[12].mxu1 }
 0x300   :  { %v1482_v46 = vadd.f32 %v2851_v17, %v4121_v5  ;;  %v1473_v19 = vpop.f32.mrb[13].mxu1 }
 0x301   :  { %v1474_v24 = vadd.f32 %v4121_v5, %v1473_v19  ;;  %v2852_v47 = vpop.f32.mrb[14].mxu1 }
 0x302   :  { %v1485_v12 = vadd.f32 %v2852_v47, %v4121_v5  ;;  %v1476_v48 = vpop.f32.mrb[15].mxu1  ;;  %v1566_v33 = vmax.f32 %v1482_v46, 0.0 }
 0x303   :  { %v1477_v30 = vadd.f32 %v4121_v5, %v1476_v48  ;;  %v1564_v36 = vmax.f32 %v1474_v24, 0.0 }
 0x304   :  { %v1567_v49 = vmax.f32 %v1485_v12, 0.0 }
 0x305   :  { %v1565_v52 = vmax.f32 %v1477_v30, 0.0 }
 0x306   :  { %v1591_v16 = vpack.c.bf16 %v1567_v49, %v1566_v33 }
 0x307   :  { %v1590_v51 = vpack.c.bf16 %v1565_v52, %v1564_v36 }
 0x309   :  { %2897 = vmatprep.mubr.bf16.mxu0 %v1590_v51 }
 0x30a   :  { %2898 = vmatmul.mubr.bf16.gmra.mrb[44].mxu0 %v1591_v16 }
 0x337   :  { %v2855_v56 = vpop.f32.mrb[16].mxu1 }
 0x338   :  { %v1498_v35 = vadd.f32 %v2855_v56, %v4121_v5  ;;  %v1489_v57 = vpop.f32.mrb[17].mxu1 }
 0x339   :  { %v1490_v60 = vadd.f32 %v4121_v5, %v1489_v57  ;;  %v2856_v59 = vpop.f32.mrb[18].mxu1 }
 0x33a   :  { %v1501_v11 = vadd.f32 %v2856_v59, %v4121_v5  ;;  %v1492_v55 = vpop.f32.mrb[19].mxu1  ;;  %v1570_v42 = vmax.f32 %v1498_v35, 0.0 }
 0x33b   :  { %v1493_v62 = vadd.f32 %v4121_v5, %v1492_v55  ;;  %v1568_v2 = vmax.f32 %v1490_v60, 0.0 }
 0x33c   :  { %v1571_v6 = vmax.f32 %v1501_v11, 0.0 }
 0x33d   :  { %v1569_v3 = vmax.f32 %v1493_v62, 0.0 }
 0x33e   :  { %v1593_v7 = vpack.c.bf16 %v1571_v6, %v1570_v42 }
 0x33f   :  { %v1592_v15 = vpack.c.bf16 %v1569_v3, %v1568_v2 }
 0x341   :  { %2901 = vmatprep.mubr.bf16.mxu0 %v1592_v15 }
 0x342   :  { %2902 = vmatmul.mubr.bf16.gmra.mrb[48].mxu0 %v1593_v7 }
 0x360   :  { %v2887_v14 = vpop.f32.mrb[32].mxu0 }
 0x361   :  { %v1712_v20 = vadd.f32 %v2887_v14, %v4182_v9  ;;  %v1703_v37 = vpop.f32.mrb[33].mxu0 }
 0x362   :  { %v1704_v23 = vadd.f32 %v4182_v9, %v1703_v37  ;;  %v2888_v26 = vpop.f32.mrb[34].mxu0 }
 0x363   :  { %v1715_v27 = vadd.f32 %v2888_v26, %v4182_v9  ;;  %v1706_v28 = vpop.f32.mrb[35].mxu0  ;;  %v1832_v32 = vmax.f32 %v1712_v20, 0.0 }
 0x364   :  { %v1707_v25 = vadd.f32 %v4182_v9, %v1706_v28  ;;  %v1830_v58 = vmax.f32 %v1704_v23, 0.0 }
 0x365   :  { %v1833_v34 = vmax.f32 %v1715_v27, 0.0 }
 0x366   :  { %v1831_v54 = vmax.f32 %v1707_v25, 0.0 }
 0x367   :  { %v1863_v53 = vpack.c.bf16 %v1833_v34, %v1832_v32  ;;  %v2859_v39 = vpop.f32.mrb[20].mxu1 }
 0x368   :  { %v1862_v41 = vpack.c.bf16 %v1831_v54, %v1830_v58  ;;  %v1514_v38 = vadd.f32 %v2859_v39, %v4121_v5  ;;  %v1505_v45 = vpop.f32.mrb[21].mxu1 }
 0x369   :  { %v1506_v13 = vadd.f32 %v4121_v5, %v1505_v45  ;;  %v2860_v17 = vpop.f32.mrb[22].mxu1 }
 0x36a   :  { %v1517_v46 = vadd.f32 %v2860_v17, %v4121_v5  ;;  %v1508_v19 = vpop.f32.mrb[23].mxu1  ;;  %2933 = vmatprep.mubr.bf16.mxu1 %v1862_v41  ;;  %v1574_v47 = vmax.f32 %v1514_v38, 0.0 }
 0x36b   :  { %v1509_v24 = vadd.f32 %v4121_v5, %v1508_v19  ;;  %2934 = vmatmul.mubr.bf16.vlgmr.msra.gmra.mrb[32].mxu1 %v1863_v53  ;;  %v1572_v48 = vmax.f32 %v1506_v13, 0.0 }
 0x36c   :  { %v1575_v12 = vmax.f32 %v1517_v46, 0.0  ;;  %3032 = vmatpush3.bf16.xpose.msra.mxu1 %v3952_v4 }
 0x36d   :  { %v1573_v30 = vmax.f32 %v1509_v24, 0.0  ;;  %3034 = vmatprep.subr.bf16.mxu1 %v4116_v63 }
 0x36e   :  { %v1595_v33 = vpack.c.bf16 %v1575_v12, %v1574_v47 }
 0x36f   :  { %v1594_v49 = vpack.c.bf16 %v1573_v30, %v1572_v48 }
 0x371   :  { %2905 = vmatprep.mubr.bf16.mxu0 %v1594_v49 }
 0x372   :  { %2906 = vmatmul.mubr.bf16.gmra.mrb[52].mxu0 %v1595_v33 }
 0x374   :  { %3036 = vmatpush3.bf16.xpose.msra.mxu1 %v3965_v50 }
 0x375   :  { %3038 = vmatprep.subr.bf16.mxu1 %v4128_v44 }
 0x379   :  { %v2891_v36 = vpop.f32.mrb[36].mxu0 }
 0x37a   :  { %v1728_v52 = vadd.f32 %v2891_v36, %v4182_v9  ;;  %v1719_v16 = vpop.f32.mrb[37].mxu0 }
 0x37b   :  { %v1720_v51 = vadd.f32 %v4182_v9, %v1719_v16  ;;  %v2892_v56 = vpop.f32.mrb[38].mxu0 }
 0x37c   :  { %v1731_v4 = vadd.f32 %v2892_v56, %v4182_v9  ;;  %3040 = vmatpush3.bf16.xpose.msra.mxu1 %v3979_v61  ;;  %v1722_v63 = vpop.f32.mrb[39].mxu0  ;;  %v1836_v57 = vmax.f32 %v1728_v52, 0.0 }
 0x37d   :  { %v1723_v35 = vadd.f32 %v4182_v9, %v1722_v63  ;;  %3042 = vmatprep.subr.bf16.mxu1 %v4137_v0  ;;  %v1834_v60 = vmax.f32 %v1720_v51, 0.0 }
 0x37e   :  { %v1837_v50 = vmax.f32 %v1731_v4, 0.0 }
 0x37f   :  { %v1835_v44 = vmax.f32 %v1723_v35, 0.0 }
 0x380   :  { %v1865_v59 = vpack.c.bf16 %v1837_v50, %v1836_v57 }
 0x381   :  { %v1864_v11 = vpack.c.bf16 %v1835_v44, %v1834_v60 }
 0x383   :  { %2937 = vmatprep.mubr.bf16.mxu1 %v1864_v11 }
 0x384   :  { %3044 = vmatpush3.bf16.xpose.msra.mxu1 %v3987_v29 }
 0x385   :  { %2938 = vmatmul.mubr.bf16.gmra.mrb[36].mxu1 %v1865_v59  ;;  %3046 = vmatprep.subr.bf16.mxu1 %v4147_v22 }
 0x38c   :  { %3048 = vmatpush3.bf16.xpose.msra.mxu1 %v4021_v10 }
 0x38d   :  { %3050 = vmatprep.subr.bf16.mxu1 %v4153_v18 }
 0x394   :  { %3052 = vmatpush3.bf16.xpose.msra.mxu1 %v4049_v40 }
 0x395   :  { %3054 = vmatprep.subr.bf16.mxu1 %v4163_v31 }
 0x397   :  { %v2863_v61 = vpop.f32.mrb[24].mxu1 }
 0x398   :  { %v1530_v0 = vadd.f32 %v2863_v61, %v4121_v5  ;;  %v1521_v55 = vpop.f32.mrb[25].mxu1 }
 0x399   :  { %v1522_v62 = vadd.f32 %v4121_v5, %v1521_v55  ;;  %v2864_v42 = vpop.f32.mrb[26].mxu1 }
 0x39a   :  { %v1533_v29 = vadd.f32 %v2864_v42, %v4121_v5  ;;  %v1524_v6 = vpop.f32.mrb[27].mxu1  ;;  %v1578_v2 = vmax.f32 %v1530_v0, 0.0 }
 0x39b   :  { %v1525_v22 = vadd.f32 %v4121_v5, %v1524_v6  ;;  %v1576_v18 = vmax.f32 %v1522_v62, 0.0 }
 0x39c   :  { %v1579_v10 = vmax.f32 %v1533_v29, 0.0  ;;  %3056 = vmatpush3.bf16.xpose.msra.mxu1 %v4095_v21 }
 0x39d   :  { %v1577_v40 = vmax.f32 %v1525_v22, 0.0  ;;  %3058 = vmatprep.subr.bf16.mxu1 %v4169_v1 }
 0x39e   :  { %v1597_v31 = vpack.c.bf16 %v1579_v10, %v1578_v2  ;;  %v4234_v2 = vld [vmem:[%s4326_s5 + $0x2] ss:$0 sm:$0xff] }
 0x39f   :  { %v1596_v3 = vpack.c.bf16 %v1577_v40, %v1576_v18 }
 0x3a1   :  { %2909 = vmatprep.mubr.bf16.mxu0 %v1596_v3 }
 0x3a2   :  { %2910 = vmatmul.mubr.bf16.gmra.mrb[56].mxu0 %v1597_v31 }
 0x3a4   :  { %3060 = vmatpush3.bf16.xpose.msra.mxu1 %v4106_v43 }
 0x3ab   :  { %v2895_v7 = vpop.f32.mrb[40].mxu0 }
 0x3ac   :  { %v1744_v15 = vadd.f32 %v2895_v7, %v4182_v9  ;;  %v1735_v14 = vpop.f32.mrb[41].mxu0 }
 0x3ad   :  { %v1736_v20 = vadd.f32 %v4182_v9, %v1735_v14  ;;  %v2896_v37 = vpop.f32.mrb[42].mxu0 }
 0x3ae   :  { %v1747_v23 = vadd.f32 %v2896_v37, %v4182_v9  ;;  %v1738_v21 = vpop.f32.mrb[43].mxu0  ;;  %v1840_v27 = vmax.f32 %v1744_v15, 0.0 }
 0x3af   :  { %v1739_v26 = vadd.f32 %v4182_v9, %v1738_v21  ;;  %v1838_v28 = vmax.f32 %v1736_v20, 0.0 }
 0x3b0   :  { %v1841_v1 = vmax.f32 %v1747_v23, 0.0 }
 0x3b1   :  { %v1839_v25 = vmax.f32 %v1739_v26, 0.0 }
 0x3b2   :  { %v1867_v32 = vpack.c.bf16 %v1841_v1, %v1840_v27 }
 0x3b3   :  { %v1866_v34 = vpack.c.bf16 %v1839_v25, %v1838_v28 }
 0x3b5   :  { %2941 = vmatprep.mubr.bf16.mxu1 %v1866_v34 }
 0x3b6   :  { %2942 = vmatmul.mubr.bf16.gmra.mrb[40].mxu1 %v1867_v32 }
 0x3c7   :  { %v2867_v43 = vpop.f32.mrb[28].mxu1 }
 0x3c8   :  { %v1546_v58 = vadd.f32 %v2867_v43, %v4121_v5  ;;  %v1537_v54 = vpop.f32.mrb[29].mxu1 }
 0x3c9   :  { %v1538_v53 = vadd.f32 %v4121_v5, %v1537_v54  ;;  %v2868_v39 = vpop.f32.mrb[30].mxu1 }
 0x3ca   :  { %v1549_v41 = vadd.f32 %v2868_v39, %v4121_v5  ;;  %v1540_v38 = vpop.f32.mrb[31].mxu1  ;;  %v1582_v13 = vmax.f32 %v1546_v58, 0.0 }
 0x3cb   :  { %v1541_v45 = vadd.f32 %v4121_v5, %v1540_v38  ;;  %v1580_v46 = vmax.f32 %v1538_v53, 0.0 }
 0x3cc   :  { %v1583_v17 = vmax.f32 %v1549_v41, 0.0 }
 0x3cd   :  { %v1581_v19 = vmax.f32 %v1541_v45, 0.0 }
 0x3ce   :  { %v1599_v24 = vpack.c.bf16 %v1583_v17, %v1582_v13 }
 0x3cf   :  { %v1598_v47 = vpack.c.bf16 %v1581_v19, %v1580_v46 }
 0x3d1   :  { %2913 = vmatprep.mubr.bf16.mxu0 %v1598_v47 }
 0x3d2   :  { %2914 = vmatmul.mubr.bf16.gmra.mrb[60].mxu0 %v1599_v24 }
 0x3dd   :  { %v2899_v12 = vpop.f32.mrb[44].mxu0 }
 0x3de   :  { %v1760_v48 = vadd.f32 %v2899_v12, %v4182_v9  ;;  %v1751_v30 = vpop.f32.mrb[45].mxu0 }
 0x3df   :  { %v1752_v33 = vadd.f32 %v4182_v9, %v1751_v30  ;;  %v2900_v49 = vpop.f32.mrb[46].mxu0 }
 0x3e0   :  { %v1763_v36 = vadd.f32 %v2900_v49, %v4182_v9  ;;  %v1754_v52 = vpop.f32.mrb[47].mxu0  ;;  %v1844_v16 = vmax.f32 %v1760_v48, 0.0 }
 0x3e1   :  { %v1755_v5 = vadd.f32 %v4182_v9, %v1754_v52  ;;  %v1842_v56 = vmax.f32 %v1752_v33, 0.0 }
 0x3e2   :  { %v1845_v51 = vmax.f32 %v1763_v36, 0.0 }
 0x3e3   :  { %v1843_v4 = vmax.f32 %v1755_v5, 0.0 }
 0x3e4   :  { %v1869_v63 = vpack.c.bf16 %v1845_v51, %v1844_v16 }
 0x3e5   :  { %v1868_v35 = vpack.c.bf16 %v1843_v4, %v1842_v56 }
 0x3e7   :  { %2945 = vmatprep.mubr.bf16.mxu1 %v1868_v35 }
 0x3e8   :  { %2946 = vmatmul.mubr.bf16.gmra.mrb[44].mxu1 %v1869_v63 }
 0x415   :  { %v2903_v57 = vpop.f32.mrb[48].mxu0 }
 0x416   :  { %v1776_v50 = vadd.f32 %v2903_v57, %v4182_v9  ;;  %v1767_v60 = vpop.f32.mrb[49].mxu0 }
 0x417   :  { %v1768_v44 = vadd.f32 %v4182_v9, %v1767_v60  ;;  %v2904_v59 = vpop.f32.mrb[50].mxu0 }
 0x418   :  { %v1779_v11 = vadd.f32 %v2904_v59, %v4182_v9  ;;  %v1770_v61 = vpop.f32.mrb[51].mxu0  ;;  %v1848_v55 = vmax.f32 %v1776_v50, 0.0 }
 0x419   :  { %v1771_v0 = vadd.f32 %v4182_v9, %v1770_v61  ;;  %v1846_v42 = vmax.f32 %v1768_v44, 0.0 }
 0x41a   :  { %v1849_v62 = vmax.f32 %v1779_v11, 0.0 }
 0x41b   :  { %v1847_v29 = vmax.f32 %v1771_v0, 0.0 }
 0x41c   :  { %v1871_v6 = vpack.c.bf16 %v1849_v62, %v1848_v55 }
 0x41d   :  { %v1870_v22 = vpack.c.bf16 %v1847_v29, %v1846_v42 }
 0x41f   :  { %2949 = vmatprep.mubr.bf16.mxu1 %v1870_v22 }
 0x420   :  { %2950 = vmatmul.mubr.bf16.gmra.mrb[48].mxu1 %v1871_v6 }
 0x43e   :  { %v2935_v10 = vpop.f32.mrb[32].mxu1 }
 0x43f   :  { %v1990_v18 = vadd.f32 %v2935_v10, %v4234_v2  ;;  %v1981_v40 = vpop.f32.mrb[33].mxu1 }
 0x440   :  { %v1982_v31 = vadd.f32 %v4234_v2, %v1981_v40  ;;  %v2936_v3 = vpop.f32.mrb[34].mxu1 }
 0x441   :  { %v1993_v7 = vadd.f32 %v2936_v3, %v4234_v2  ;;  %v1984_v15 = vpop.f32.mrb[35].mxu1  ;;  %v2110_v20 = vmax.f32 %v1990_v18, 0.0 }
 0x442   :  { %v1985_v14 = vadd.f32 %v4234_v2, %v1984_v15  ;;  %v2108_v23 = vmax.f32 %v1982_v31, 0.0 }
 0x443   :  { %v2111_v37 = vmax.f32 %v1993_v7, 0.0 }
 0x444   :  { %v2109_v21 = vmax.f32 %v1985_v14, 0.0 }
 0x445   :  { %v4240_v26 = vpack.c.bf16 %v2111_v37, %v2110_v20  ;;  %v2907_v27 = vpop.f32.mrb[52].mxu0 }
 0x446   :  { %v4242_v1 = vpack.c.bf16 %v2109_v21, %v2108_v23  ;;  %v1792_v28 = vadd.f32 %v2907_v27, %v4182_v9  ;;  %v1783_v25 = vpop.f32.mrb[53].mxu0 }
 0x447   :  { %v1784_v32 = vadd.f32 %v4182_v9, %v1783_v25  ;;  %v2908_v34 = vpop.f32.mrb[54].mxu0 }
 0x448   :  { %v1795_v43 = vadd.f32 %v2908_v34, %v4182_v9  ;;  %v1786_v58 = vpop.f32.mrb[55].mxu0  ;;  %v1852_v53 = vmax.f32 %v1792_v28, 0.0 }
 0x449   :  { %v1787_v54 = vadd.f32 %v4182_v9, %v1786_v58  ;;  %v1850_v41 = vmax.f32 %v1784_v32, 0.0 }
 0x44a   :  { %v1853_v39 = vmax.f32 %v1795_v43, 0.0 }
 0x44b   :  { %v1851_v38 = vmax.f32 %v1787_v54, 0.0 }
 0x44c   :  { %v1873_v45 = vpack.c.bf16 %v1853_v39, %v1852_v53 }
 0x44d   :  { %v1872_v13 = vpack.c.bf16 %v1851_v38, %v1850_v41 }
 0x44f   :  { %2953 = vmatprep.mubr.bf16.mxu1 %v1872_v13 }
 0x450   :  { %2954 = vmatmul.mubr.bf16.gmra.mrb[52].mxu1 %v1873_v45 }
 0x458   :  { %v2939_v17 = vpop.f32.mrb[36].mxu1 }
 0x459   :  { %v2006_v46 = vadd.f32 %v2939_v17, %v4234_v2  ;;  %v1997_v19 = vpop.f32.mrb[37].mxu1 }
 0x45a   :  { %v1998_v24 = vadd.f32 %v4234_v2, %v1997_v19  ;;  %v2940_v47 = vpop.f32.mrb[38].mxu1 }
 0x45b   :  { %v2009_v12 = vadd.f32 %v2940_v47, %v4234_v2  ;;  %v2000_v48 = vpop.f32.mrb[39].mxu1  ;;  %v2114_v33 = vmax.f32 %v2006_v46, 0.0 }
 0x45c   :  { %v2001_v30 = vadd.f32 %v4234_v2, %v2000_v48  ;;  %v2112_v36 = vmax.f32 %v1998_v24, 0.0 }
 0x45d   :  { %v2115_v49 = vmax.f32 %v2009_v12, 0.0 }
 0x45e   :  { %v2113_v52 = vmax.f32 %v2001_v30, 0.0 }
 0x45f   :  { %v4252_v5 = vpack.c.bf16 %v2115_v49, %v2114_v33 }
 0x460   :  { %v4254_v16 = vpack.c.bf16 %v2113_v52, %v2112_v36 }
 0x475   :  { %v2911_v51 = vpop.f32.mrb[56].mxu0 }
 0x476   :  { %v1808_v56 = vadd.f32 %v2911_v51, %v4182_v9  ;;  %v1799_v4 = vpop.f32.mrb[57].mxu0 }
 0x477   :  { %v1800_v63 = vadd.f32 %v4182_v9, %v1799_v4  ;;  %v2912_v35 = vpop.f32.mrb[58].mxu0 }
 0x478   :  { %v1811_v57 = vadd.f32 %v2912_v35, %v4182_v9  ;;  %v1802_v50 = vpop.f32.mrb[59].mxu0  ;;  %v1856_v44 = vmax.f32 %v1808_v56, 0.0 }
 0x479   :  { %v1803_v60 = vadd.f32 %v4182_v9, %v1802_v50  ;;  %v1854_v11 = vmax.f32 %v1800_v63, 0.0 }
 0x47a   :  { %v1857_v59 = vmax.f32 %v1811_v57, 0.0 }
 0x47b   :  { %v1855_v61 = vmax.f32 %v1803_v60, 0.0 }
 0x47c   :  { %v1875_v0 = vpack.c.bf16 %v1857_v59, %v1856_v44 }
 0x47d   :  { %v1874_v55 = vpack.c.bf16 %v1855_v61, %v1854_v11 }
 0x47f   :  { %2957 = vmatprep.mubr.bf16.mxu1 %v1874_v55 }
 0x480   :  { %2958 = vmatmul.mubr.bf16.gmra.mrb[56].mxu1 %v1875_v0  ;;  %v2207_v0 = vld [vmem:[%s4326_s5] sm:$0xff]  ;;  %s3232_s5 = smov [#allocation5]  }
 0x481   :  { %2705 = vmatprep.mubr.f32.mxu0 %v2207_v0  ;;  %s2389_s4 = sshll.u32 %s3232_s5, 4  ;;  %s2390_s4 = int_to_ptr.vmem [resolvable:$true] %s2389_s4 }
 0x482   :  { %s3197_s15 = scalar_lea.vmem %s2390_s4, 32  ;;  %p3202_p9 = scmp.lt.s32.totalorder %s2390_s4, %s2390_s4 }
 0x483   :  { %p3198_p8 = scmp.ne.s32.totalorder %s2390_s4, %s3197_s15  ;;  %p3203_p10 = scmp.lt.s32.totalorder %s3197_s15, %s3197_s15 }
 0x485   :  { %p3204_p11 = por %p3203_p10, %p3202_p9 }
 0x487   :  { %p3205_p12 = pnand %p3204_p11, %p3198_p8 }
 0x489   :  { %v2943_v62 = vpop.f32.mrb[40].mxu1 }
 0x48a   :  { %v2022_v42 = vadd.f32 %v2943_v62, %v4234_v2  ;;  %v2013_v29 = vpop.f32.mrb[41].mxu1 }
 0x48b   :  { %v2014_v6 = vadd.f32 %v4234_v2, %v2013_v29  ;;  %v2944_v22 = vpop.f32.mrb[42].mxu1 }
 0x48c   :  { %v2025_v10 = vadd.f32 %v2944_v22, %v4234_v2  ;;  %v2016_v18 = vpop.f32.mrb[43].mxu1  ;;  %v2118_v31 = vmax.f32 %v2022_v42, 0.0 }
 0x48d   :  { %v2017_v40 = vadd.f32 %v4234_v2, %v2016_v18  ;;  %v2116_v7 = vmax.f32 %v2014_v6, 0.0 }
 0x48e   :  { %v2119_v3 = vmax.f32 %v2025_v10, 0.0 }
 0x48f   :  { %v2117_v15 = vmax.f32 %v2017_v40, 0.0 }
 0x490   :  { %v4264_v14 = vpack.c.bf16 %v2119_v3, %v2118_v31 }
 0x491   :  { %v4266_v20 = vpack.c.bf16 %v2117_v15, %v2116_v7 }
 0x4a5   :  { %v2915_v37 = vpop.f32.mrb[60].mxu0 }
 0x4a6   :  { %v1824_v23 = vadd.f32 %v2915_v37, %v4182_v9  ;;  %v1815_v21 = vpop.f32.mrb[61].mxu0 }
 0x4a7   :  { %v1816_v27 = vadd.f32 %v4182_v9, %v1815_v21  ;;  %v2916_v28 = vpop.f32.mrb[62].mxu0 }
 0x4a8   :  { %v1827_v25 = vadd.f32 %v2916_v28, %v4182_v9  ;;  %v1818_v32 = vpop.f32.mrb[63].mxu0  ;;  %v1860_v43 = vmax.f32 %v1824_v23, 0.0 }
 0x4a9   :  { %v1819_v34 = vadd.f32 %v4182_v9, %v1818_v32  ;;  %v1858_v54 = vmax.f32 %v1816_v27, 0.0 }
 0x4aa   :  { %v1861_v58 = vmax.f32 %v1827_v25, 0.0 }
 0x4ab   :  { %v1859_v53 = vmax.f32 %v1819_v34, 0.0 }
 0x4ac   :  { %v1877_v39 = vpack.c.bf16 %v1861_v58, %v1860_v43 }
 0x4ad   :  { %v1876_v41 = vpack.c.bf16 %v1859_v53, %v1858_v54 }
 0x4af   :  { %2961 = vmatprep.mubr.bf16.mxu1 %v1876_v41 }
 0x4b0   :  { %2962 = vmatmul.mubr.bf16.gmra.mrb[60].mxu1 %v1877_v39 }
 0x4b1   :  { %2739 = vmatprep.mubr.f32.mxu1 %v2207_v0 }
 0x4b8   :  { %2740 = vmatmul.mubr.f32.vlgmr.msra.gmra.mrb[64].mxu1 %v2207_v0 }
 0x4bb   :  { %v2947_v38 = vpop.f32.mrb[44].mxu1 }
 0x4bc   :  { %v2038_v45 = vadd.f32 %v2947_v38, %v4234_v2  ;;  %v2029_v13 = vpop.f32.mrb[45].mxu1 }
 0x4bd   :  { %v2030_v17 = vadd.f32 %v4234_v2, %v2029_v13  ;;  %v2948_v46 = vpop.f32.mrb[46].mxu1 }
 0x4be   :  { %v2041_v19 = vadd.f32 %v2948_v46, %v4234_v2  ;;  %v2032_v24 = vpop.f32.mrb[47].mxu1  ;;  %v2122_v47 = vmax.f32 %v2038_v45, 0.0 }
 0x4bf   :  { %v2033_v9 = vadd.f32 %v4234_v2, %v2032_v24  ;;  %v2120_v48 = vmax.f32 %v2030_v17, 0.0 }
 0x4c0   :  { %v2123_v12 = vmax.f32 %v2041_v19, 0.0 }
 0x4c1   :  { %v2121_v30 = vmax.f32 %v2033_v9, 0.0 }
 0x4c2   :  { %v4276_v33 = vpack.c.bf16 %v2123_v12, %v2122_v47 }
 0x4c3   :  { %v4278_v49 = vpack.c.bf16 %v2121_v30, %v2120_v48  ;;  %v3231_v30 = vmov 1966171168  }
 0x4f3   :  { %v2951_v36 = vpop.f32.mrb[48].mxu1 }
 0x4f4   :  { %v2054_v52 = vadd.f32 %v2951_v36, %v4234_v2  ;;  %v2045_v51 = vpop.f32.mrb[49].mxu1  ;;  %v2362_v36 = vunpack.c.l.s4 %v3231_v30 }
 0x4f5   :  { %v2046_v56 = vadd.f32 %v4234_v2, %v2045_v51  ;;  %v2952_v4 = vpop.f32.mrb[50].mxu1 }
 0x4f6   :  { %v2057_v63 = vadd.f32 %v2952_v4, %v4234_v2  ;;  %v2048_v35 = vpop.f32.mrb[51].mxu1  ;;  %v2126_v50 = vmax.f32 %v2054_v52, 0.0 }
 0x4f7   :  { %v2049_v57 = vadd.f32 %v4234_v2, %v2048_v35  ;;  %v2124_v44 = vmax.f32 %v2046_v56, 0.0  ;;  %v2365_v56 = vshrl.u32 %v71_v8, 7 }
 0x4f8   :  { %v2127_v60 = vmax.f32 %v2057_v63, 0.0 }
 0x4f9   :  { %v2125_v59 = vmax.f32 %v2049_v57, 0.0 }
 0x4fa   :  { %v3001_v11 = vpack.c.bf16 %v2127_v60, %v2126_v50 }
 0x4fb   :  { %v2997_v61 = vpack.c.bf16 %v2125_v59, %v2124_v44 }
 0x4fd   :  { %2998 = vmatprep.subr.bf16.mxu0 %v2997_v61 }
 0x4fe   :  { %3000 = vmatpush3.bf16.xpose.msra.mxu0 %v4242_v1 }
 0x4ff   :  { %3002 = vmatprep.subr.bf16.mxu0 %v3001_v11 }
 0x506   :  { %3004 = vmatpush3.bf16.xpose.msra.mxu0 %v4240_v26 }
 0x523   :  { %v2955_v55 = vpop.f32.mrb[52].mxu1 }
 0x524   :  { %v2070_v62 = vadd.f32 %v2955_v55, %v4234_v2  ;;  %v2061_v42 = vpop.f32.mrb[53].mxu1 }
 0x525   :  { %v2062_v29 = vadd.f32 %v4234_v2, %v2061_v42  ;;  %v2956_v6 = vpop.f32.mrb[54].mxu1 }
 0x526   :  { %v2073_v22 = vadd.f32 %v2956_v6, %v4234_v2  ;;  %v2064_v1 = vpop.f32.mrb[55].mxu1  ;;  %v2130_v26 = vmax.f32 %v2070_v62, 0.0 }
 0x527   :  { %v2065_v10 = vadd.f32 %v4234_v2, %v2064_v1  ;;  %v2128_v40 = vmax.f32 %v2062_v29, 0.0 }
 0x528   :  { %v2131_v18 = vmax.f32 %v2073_v22, 0.0 }
 0x529   :  { %v2129_v31 = vmax.f32 %v2065_v10, 0.0 }
 0x52a   :  { %v3009_v3 = vpack.c.bf16 %v2131_v18, %v2130_v26 }
 0x52b   :  { %v3005_v7 = vpack.c.bf16 %v2129_v31, %v2128_v40 }
 0x52d   :  { %3006 = vmatprep.subr.bf16.mxu0 %v3005_v7 }
 0x52e   :  { %3008 = vmatpush3.bf16.xpose.msra.mxu0 %v4254_v16 }
 0x52f   :  { %3010 = vmatprep.subr.bf16.mxu0 %v3009_v3 }
 0x536   :  { %3012 = vmatpush3.bf16.xpose.msra.mxu0 %v4252_v5 }
 0x553   :  { %v2959_v15 = vpop.f32.mrb[56].mxu1 }
 0x554   :  { %v2086_v37 = vadd.f32 %v2959_v15, %v4234_v2  ;;  %v2077_v23 = vpop.f32.mrb[57].mxu1 }
 0x555   :  { %v2078_v21 = vadd.f32 %v4234_v2, %v2077_v23  ;;  %v2960_v27 = vpop.f32.mrb[58].mxu1 }
 0x556   :  { %v2089_v28 = vadd.f32 %v2960_v27, %v4234_v2  ;;  %v2080_v25 = vpop.f32.mrb[59].mxu1  ;;  %v2134_v34 = vmax.f32 %v2086_v37, 0.0 }
 0x557   :  { %v2081_v32 = vadd.f32 %v4234_v2, %v2080_v25  ;;  %v2132_v58 = vmax.f32 %v2078_v21, 0.0 }
 0x558   :  { %v2135_v43 = vmax.f32 %v2089_v28, 0.0 }
 0x559   :  { %v2133_v54 = vmax.f32 %v2081_v32, 0.0 }
 0x55a   :  { %v3017_v16 = vpack.c.bf16 %v2135_v43, %v2134_v34 }
 0x55b   :  { %v3013_v53 = vpack.c.bf16 %v2133_v54, %v2132_v58 }
 0x55d   :  { %3014 = vmatprep.subr.bf16.mxu0 %v3013_v53 }
 0x55e   :  { %3016 = vmatpush3.bf16.xpose.msra.mxu0 %v4266_v20 }
 0x55f   :  { %3018 = vmatprep.subr.bf16.mxu0 %v3017_v16 }
 0x566   :  { %3020 = vmatpush3.bf16.xpose.msra.mxu0 %v4264_v14 }
 0x583   :  { %v2963_v5 = vpop.f32.mrb[60].mxu1 }
 0x584   :  { %v2102_v39 = vadd.f32 %v2963_v5, %v4234_v2  ;;  %v2093_v41 = vpop.f32.mrb[61].mxu1 }
 0x585   :  { %v2094_v38 = vadd.f32 %v4234_v2, %v2093_v41  ;;  %v2964_v45 = vpop.f32.mrb[62].mxu1 }
 0x586   :  { %v2105_v13 = vadd.f32 %v2964_v45, %v4234_v2  ;;  %v2096_v17 = vpop.f32.mrb[63].mxu1  ;;  %v2138_v19 = vmax.f32 %v2102_v39, 0.0 }
 0x587   :  { %v2097_v46 = vadd.f32 %v4234_v2, %v2096_v17  ;;  %v2136_v9 = vmax.f32 %v2094_v38, 0.0  ;;  %v2363_v2 = vunpack.c.0.s8 %v2362_v36 }
 0x588   :  { %v2139_v24 = vmax.f32 %v2105_v13, 0.0 }
 0x589   :  { %v2137_v47 = vmax.f32 %v2097_v46, 0.0  ;;  %v2366_v50 = vsub.s32 %v2363_v2, %v2365_v56 }
 0x58a   :  { %v3025_v20 = vpack.c.bf16 %v2139_v24, %v2138_v19 }
 0x58b   :  { %v3021_v12 = vpack.c.bf16 %v2137_v47, %v2136_v9  ;;  %v2345_v14 = vpop.f32.mrb[64].mxu1 }
 0x58c   :  { %v2347_v48 = vpop.f32.mrb[65].mxu1  ;;  %v2352_v52 = vrot.slane %v2345_v14, 1 }
 0x58d   :  { %3022 = vmatprep.subr.bf16.mxu0 %v3021_v12  ;;  %v2353_v51 = vrot.slane %v2347_v48, 1 }
 0x58e   :  { %3024 = vmatpush3.bf16.xpose.msra.mxu0 %v4278_v49 }
 0x58f   :  { %3026 = vmatprep.subr.bf16.mxu0 %v3025_v20 }
 0x596   :  { %3028 = vmatpush3.bf16.xpose.msra.mxu0 %v4276_v33 }
 0x59d   :  { %2706 = vmatmul.mubr.f32.vlgmr.msra.gmra.mrb[64].mxu0 %v2207_v0 }
 0x670   :  { %v2274_v4 = vpop.f32.mrb[64].mxu0 }
 0x671   :  { %v2356_v63 = vadd.f32 %v2352_v52, %v2274_v4  ;;  %v2276_v35 = vpop.f32.mrb[65].mxu0 }
 0x672   :  { %v2357_v57 = vadd.f32 %v2353_v51, %v2276_v35 }
 0x674   :  { %v2360_v60 = vcombine.low %v2356_v63, %v2357_v57 }
 0x676   :  { %v2367_v49 = vrot.slane %v2360_v60, %v2366_v50 }
 0x678   :  { %v2368_v44 = vcombine.high %v2367_v49, %v2367_v49 }
 0x67a   :  { %v2375_v33 = vrot.slane %v2368_v44, %v2366_v50 }
 0x67c   :  { %v2376_v59 = vcombine.high %v2375_v33, %v2375_v33 }
 0x67e   :  { %2382 = vst.msk [vmem:[#allocation5] sm:$0x3] %vm2380_vm8, %v2376_v59 }
 0x67f   :  { %3208 = shalt.err (!%p3205_p12)
}
 0x680   :  { %s3209_s18 = scalar_lea.hbm %s4327_s6, 32 }
 0x681   :  { %p3210_p13 = scmp.ne.s32.totalorder %s4327_s6, %s3209_s18  ;;  %p3213_p0 = scmp.lt.u32.totalorder %s3209_s18, %s4327_s6 }
 0x683   :  { %p3215_p1 = pnand %p3213_p0, %p3210_p13 }
 0x685   :  { %3218 = shalt.err (!%p3215_p1)
}
 0x686   :  { %2392 = dma.vmem_to_hbm [thread:$0]  %s2390_s4, 32, %s4327_s6, [#allocation4]  }
 0x687   :  { %3221 = dma.done.wait [#allocation4], 32  }
 0x688   :  { %3222 = vsyncadd [#allocation4], 4294967264 }
 0x689   :  { %2396 = vsyncpa [#allocation3], 1 }
 0x68a   :  { %2397 = vsyncpa [#allocation4], 1 }

</bundles_post_ra>
